<compile_context>
chip_gen: v6e
topology: v6e:2x2x1
jax: 0.10.0
libtpu: 0.0.40
codegen_flags: <defaults>
</compile_context>

<pallas_src>
import jax
import jax.numpy as jnp
from jax.experimental import pallas as pl
from jax.experimental.pallas import tpu as pltpu


def _pointnet_kernel(x_ref, w1_ref, b1_ref, w2_ref, b2_ref, w3_ref, b3_ref,
                     o_ref):
    # x_ref:  (1, Cin, Nt)  bf16 or f32
    # w1_ref: (64, Cin) f32    b1_ref: (64, 1) f32
    # w2_ref: (128, 64) bf16   b2_ref: (128, 1) f32
    # w3_ref: (F, 128)  bf16   b3_ref: (F, 1) f32
    # o_ref:  (1, F, 128) f32  -- lane-wide running max, output-resident acc
    n = pl.program_id(1)
    _, cin, nt = x_ref.shape

    x = x_ref[0].astype(jnp.float32)                           # (Cin, Nt)

    # ---- layer 1: Cin is tiny (3) -> VPU broadcast FMAs, not a K=3 MXU op.
    w1 = w1_ref[...]
    h1 = b1_ref[...] + w1[:, 0:1] * x[0:1, :]                  # (64, Nt)
    for k in range(1, cin):                                    # static unroll
        h1 = h1 + w1[:, k:k + 1] * x[k:k + 1, :]
    h1 = jnp.maximum(h1, 0.0)

    # ---- layer 2: 64 -> 128, bf16 MXU matmul, f32 accumulation.
    h2 = jnp.dot(w2_ref[...], h1.astype(jnp.bfloat16),
                 preferred_element_type=jnp.float32) + b2_ref[...]  # (128, Nt)
    h2 = jnp.maximum(h2, 0.0)

    # ---- layer 3: 128 -> F, bf16 MXU matmul, f32 accumulation (no relu).
    h3 = jnp.dot(w3_ref[...], h2.astype(jnp.bfloat16),
                 preferred_element_type=jnp.float32) + b3_ref[...]  # (F, Nt)

    # ---- lane-wide partial max over the points (128-aligned lane slices are
    #      free views; each max is pure elementwise VPU work, no XLU here).
    partial = h3[:, 0:128]                                     # (F, 128)
    for c in range(1, nt // 128):                              # static unroll
        partial = jnp.maximum(partial, h3[:, c * 128:(c + 1) * 128])

    # ---- output-resident running max across the point-tile (n) grid axis.
    @pl.when(n == 0)
    def _init():
        o_ref[...] = jnp.full(o_ref.shape, -jnp.inf, o_ref.dtype)

    o_ref[0] = jnp.maximum(o_ref[0], partial)


def _pick_point_tile(n_points, max_points=4096):
    """Largest multiple-of-128 divisor of N within a VMEM-safe point budget."""
    # Exact divisibility keeps the global max free of padded columns.
    # TODO(synk): N not a multiple of 128 would need -inf masking of pad lanes.
    assert n_points % 128 == 0, "num_points must be a multiple of 128"
    if n_points <= max_points:
        return n_points
    best = 128
    t = 128
    while t <= max_points:
        if n_points % t == 0:
            best = t
        t += 128
    return best


def pointnetfeat_mini(x_ncw, params):
    """x_ncw: (B, Cin, N), f32 or bf16, PyTorch NCW layout.  Returns (B, F) f32."""
    w1, b1, w2, b2, w3, b3 = params
    B, Cin, N = x_ncw.shape
    F = w3.shape[0]

    nt = _pick_point_tile(N)
    assert N % nt == 0 and nt % 128 == 0

    # Grid: one batch element per step ("parallel" -> B>=2 feeds both v7x TCs),
    # point tiles on the "arbitrary" reduction axis (usually a single step).
    grid = (B, N // nt)

    out = pl.pallas_call(
        _pointnet_kernel,
        out_shape=jax.ShapeDtypeStruct((B, F, 128), jnp.float32),
        grid_spec=pltpu.PrefetchScalarGridSpec(
            num_scalar_prefetch=0,
            grid=grid,
            in_specs=[
                pl.BlockSpec((1, Cin, nt), lambda b, n: (b, 0, n)),  # x (NCW)
                pl.BlockSpec(w1.shape, lambda b, n: (0, 0)),         # W1 (64, Cin)
                pl.BlockSpec(b1.shape, lambda b, n: (0, 0)),         # b1 (64, 1)
                pl.BlockSpec(w2.shape, lambda b, n: (0, 0)),         # W2 (128, 64)
                pl.BlockSpec(b2.shape, lambda b, n: (0, 0)),         # b2 (128, 1)
                pl.BlockSpec(w3.shape, lambda b, n: (0, 0)),         # W3 (F, 128)
                pl.BlockSpec(b3.shape, lambda b, n: (0, 0)),         # b3 (F, 1)
            ],
            out_specs=pl.BlockSpec((1, F, 128), lambda b, n: (b, 0, 0)),
        ),
        compiler_params=pltpu.CompilerParams(
            dimension_semantics=("parallel", "arbitrary"),
            vmem_limit_bytes=32 * 1024 * 1024,
        ),
    )(x_ncw, w1, b1, w2, b2, w3, b3)

    # Final (tiny) 128 -> 1 cross-lane reduction outside the hot loop.
    return jnp.max(out, axis=-1)                                # (B, F)


def _fold_bn(w, b, gamma, beta, mean, var, eps=1e-5):
    """Fold inference-mode BatchNorm1d into a 1x1-conv weight/bias.

    w: (Cout, Cin), b: (Cout,).  Returns (Cout, Cin), (Cout,).
    """
    scale = gamma / jnp.sqrt(var + eps)          # (Cout,)
    return w * scale[:, None], (b - mean) * scale + beta


def make_params(key, in_dim, global_feat_dim):
    """Deterministic synthetic parameters (conv weights/biases + BN stats)."""
    dims = [(in_dim, 64), (64, 128), (128, global_feat_dim)]
    params = []
    for i, (cin, cout) in enumerate(dims):
        k = jax.random.fold_in(key, i)
        kw, kb, kg, kbt, km, kv = jax.random.split(k, 6)
        # PyTorch Conv1d weight is (Cout, Cin, 1); stored squeezed as (Cout, Cin).
        w = jax.random.normal(kw, (cout, cin), jnp.float32) * 0.05
        b = jax.random.normal(kb, (cout,), jnp.float32) * 0.05
        gamma = 1.0 + 0.1 * jax.random.normal(kg, (cout,), jnp.float32)
        beta = 0.1 * jax.random.normal(kbt, (cout,), jnp.float32)
        mean = 0.1 * jax.random.normal(km, (cout,), jnp.float32)
        var = jnp.abs(1.0 + 0.1 * jax.random.normal(kv, (cout,), jnp.float32))
        w_eff, b_eff = _fold_bn(w, b, gamma, beta, mean, var)
        # Layer 1 runs on the VPU in f32; layers 2/3 feed the MXU in bf16.
        w_dtype = jnp.float32 if i == 0 else jnp.bfloat16
        params.extend([w_eff.astype(w_dtype), b_eff[:, None].astype(jnp.float32)])
    return tuple(params)


def _reference(x_ncw, params):
    """Pure-JAX reference with the same (bf16-input, f32-accumulate) precision."""
    w1, b1, w2, b2, w3, b3 = params
    x = x_ncw.astype(jnp.float32)                                    # (B, Cin, N)
    h1 = jax.nn.relu(jnp.einsum('ok,bkn->bon', w1, x) + b1[None])
    h2 = jax.nn.relu(jnp.einsum('ok,bkn->bon', w2.astype(jnp.float32),
                                h1.astype(jnp.bfloat16).astype(jnp.float32))
                     + b2[None])
    h3 = (jnp.einsum('ok,bkn->bon', w3.astype(jnp.float32),
                     h2.astype(jnp.bfloat16).astype(jnp.float32))
          + b3[None])
    return jnp.max(h3, axis=2)                                       # (B, F)


if __name__ == "__main__":
    key = jax.random.PRNGKey(0)
    B, in_dim, num_points, global_feat_dim = 4, 3, 512, 256

    kx, kp = jax.random.split(key)
    # Input kept in NCW layout like torch; fed as bf16 to halve its HBM traffic
    # (the kernel also accepts f32).
    x = jax.random.normal(kx, (B, in_dim, num_points), jnp.float32)
    x = x.astype(jnp.bfloat16)
    params = make_params(kp, in_dim, global_feat_dim)

    out = pointnetfeat_mini(x, params)
    out = jax.block_until_ready(out)

    ref = _reference(x, params)
    assert out.shape == (B, global_feat_dim)
    assert jnp.allclose(out, ref, atol=2e-3, rtol=2e-3), float(
        jnp.max(jnp.abs(out - ref)))

    print("KERNEL_OK")
</pallas_src>

<mosaic_0001>
module attributes {stable_mosaic.version = 11 : i64} {
  func.func @_pointnet_kernel(%arg0: i32, %arg1: i32, %arg2: memref<1x3x512xbf16, #tpu.memory_space<vmem>>, %arg3: memref<64x3xf32, #tpu.memory_space<vmem>>, %arg4: memref<64x1xf32, #tpu.memory_space<vmem>>, %arg5: memref<128x64xbf16, #tpu.memory_space<vmem>>, %arg6: memref<128x1xf32, #tpu.memory_space<vmem>>, %arg7: memref<256x128xbf16, #tpu.memory_space<vmem>>, %arg8: memref<256x1xf32, #tpu.memory_space<vmem>>, %arg9: memref<1x256x128xf32, #tpu.memory_space<vmem>>) attributes {dimension_semantics = [#tpu.dimension_semantics<parallel>, #tpu.dimension_semantics<arbitrary>], iteration_bounds = array<i64: 4, 1>, scalar_prefetch = 0 : i64, scratch_operands = 0 : i64, tpu.core_type = #tpu.core_type<tc>, window_params = [{transform_indices = @transform_0, window_bounds = array<i64: 1, 3, 512>}, {pipeline_mode = #tpu.pipeline_mode<synchronous>, transform_indices = @transform_1, window_bounds = array<i64: 64, 3>}, {pipeline_mode = #tpu.pipeline_mode<synchronous>, transform_indices = @transform_2, window_bounds = array<i64: 64, 1>}, {pipeline_mode = #tpu.pipeline_mode<synchronous>, transform_indices = @transform_3, window_bounds = array<i64: 128, 64>}, {pipeline_mode = #tpu.pipeline_mode<synchronous>, transform_indices = @transform_4, window_bounds = array<i64: 128, 1>}, {pipeline_mode = #tpu.pipeline_mode<synchronous>, transform_indices = @transform_5, window_bounds = array<i64: 256, 128>}, {pipeline_mode = #tpu.pipeline_mode<synchronous>, transform_indices = @transform_6, window_bounds = array<i64: 256, 1>}, {transform_indices = @transform_7, window_bounds = array<i64: 1, 256, 128>}]} {
    %c0 = arith.constant 0 : index
    %c0_0 = arith.constant 0 : index
    %c0_1 = arith.constant 0 : index
    %0 = vector.load %arg2[%c0, %c0_0, %c0_1] : memref<1x3x512xbf16, #tpu.memory_space<vmem>>, vector<1x3x512xbf16>
    %1 = vector.shape_cast %0 : vector<1x3x512xbf16> to vector<3x512xbf16>
    %2 = arith.extf %1 : vector<3x512xbf16> to vector<3x512xf32>
    %c0_2 = arith.constant 0 : index
    %c0_3 = arith.constant 0 : index
    %3 = vector.load %arg3[%c0_2, %c0_3] : memref<64x3xf32, #tpu.memory_space<vmem>>, vector<64x3xf32>
    %c0_4 = arith.constant 0 : index
    %c0_5 = arith.constant 0 : index
    %4 = vector.load %arg4[%c0_4, %c0_5] : memref<64x1xf32, #tpu.memory_space<vmem>>, vector<64x1xf32>
    %5 = vector.extract_strided_slice %3 {offsets = [0, 0], sizes = [64, 1], strides = [1, 1]} : vector<64x3xf32> to vector<64x1xf32>
    %6 = vector.extract_strided_slice %2 {offsets = [0, 0], sizes = [1, 512], strides = [1, 1]} : vector<3x512xf32> to vector<1x512xf32>
    %7 = vector.broadcast %5 : vector<64x1xf32> to vector<64x512xf32>
    %8 = vector.broadcast %6 : vector<1x512xf32> to vector<64x512xf32>
    %9 = arith.mulf %7, %8 : vector<64x512xf32>
    %10 = vector.broadcast %4 : vector<64x1xf32> to vector<64x512xf32>
    %11 = arith.addf %10, %9 : vector<64x512xf32>
    %12 = vector.extract_strided_slice %3 {offsets = [0, 1], sizes = [64, 1], strides = [1, 1]} : vector<64x3xf32> to vector<64x1xf32>
    %13 = vector.extract_strided_slice %2 {offsets = [1, 0], sizes = [1, 512], strides = [1, 1]} : vector<3x512xf32> to vector<1x512xf32>
    %14 = vector.broadcast %12 : vector<64x1xf32> to vector<64x512xf32>
    %15 = vector.broadcast %13 : vector<1x512xf32> to vector<64x512xf32>
    %16 = arith.mulf %14, %15 : vector<64x512xf32>
    %17 = arith.addf %11, %16 : vector<64x512xf32>
    %18 = vector.extract_strided_slice %3 {offsets = [0, 2], sizes = [64, 1], strides = [1, 1]} : vector<64x3xf32> to vector<64x1xf32>
    %19 = vector.extract_strided_slice %2 {offsets = [2, 0], sizes = [1, 512], strides = [1, 1]} : vector<3x512xf32> to vector<1x512xf32>
    %20 = vector.broadcast %18 : vector<64x1xf32> to vector<64x512xf32>
    %21 = vector.broadcast %19 : vector<1x512xf32> to vector<64x512xf32>
    %22 = arith.mulf %20, %21 : vector<64x512xf32>
    %23 = arith.addf %17, %22 : vector<64x512xf32>
    %cst = arith.constant 0.000000e+00 : f32
    %24 = vector.broadcast %cst : f32 to vector<64x512xf32>
    %25 = arith.maximumf %23, %24 : vector<64x512xf32>
    %c0_6 = arith.constant 0 : index
    %c0_7 = arith.constant 0 : index
    %26 = vector.load %arg5[%c0_6, %c0_7] : memref<128x64xbf16, #tpu.memory_space<vmem>>, vector<128x64xbf16>
    %27 = arith.truncf %25 : vector<64x512xf32> to vector<64x512xbf16>
    %cst_8 = arith.constant dense<0.000000e+00> : vector<128x512xf32>
    %28 = tpu.matmul %26, %27, %cst_8 {dimension_numbers = #tpu.dot_dimension_numbers<[1], [0], [0], [1], [0, 0, 1, 1], [], []>} : vector<128x64xbf16>, vector<64x512xbf16>, vector<128x512xf32> -> vector<128x512xf32>
    %c0_9 = arith.constant 0 : index
    %c0_10 = arith.constant 0 : index
    %29 = vector.load %arg6[%c0_9, %c0_10] : memref<128x1xf32, #tpu.memory_space<vmem>>, vector<128x1xf32>
    %30 = vector.broadcast %29 : vector<128x1xf32> to vector<128x512xf32>
    %31 = arith.addf %28, %30 : vector<128x512xf32>
    %cst_11 = arith.constant 0.000000e+00 : f32
    %32 = vector.broadcast %cst_11 : f32 to vector<128x512xf32>
    %33 = arith.maximumf %31, %32 : vector<128x512xf32>
    %c0_12 = arith.constant 0 : index
    %c0_13 = arith.constant 0 : index
    %34 = vector.load %arg7[%c0_12, %c0_13] : memref<256x128xbf16, #tpu.memory_space<vmem>>, vector<256x128xbf16>
    %35 = arith.truncf %33 : vector<128x512xf32> to vector<128x512xbf16>
    %cst_14 = arith.constant dense<0.000000e+00> : vector<256x512xf32>
    %36 = tpu.matmul %34, %35, %cst_14 {dimension_numbers = #tpu.dot_dimension_numbers<[1], [0], [0], [1], [0, 0, 1, 1], [], []>} : vector<256x128xbf16>, vector<128x512xbf16>, vector<256x512xf32> -> vector<256x512xf32>
    %c0_15 = arith.constant 0 : index
    %c0_16 = arith.constant 0 : index
    %37 = vector.load %arg8[%c0_15, %c0_16] : memref<256x1xf32, #tpu.memory_space<vmem>>, vector<256x1xf32>
    %38 = vector.broadcast %37 : vector<256x1xf32> to vector<256x512xf32>
    %39 = arith.addf %36, %38 : vector<256x512xf32>
    %40 = vector.extract_strided_slice %39 {offsets = [0, 0], sizes = [256, 128], strides = [1, 1]} : vector<256x512xf32> to vector<256x128xf32>
    %41 = vector.extract_strided_slice %39 {offsets = [0, 128], sizes = [256, 128], strides = [1, 1]} : vector<256x512xf32> to vector<256x128xf32>
    %42 = arith.maximumf %40, %41 : vector<256x128xf32>
    %43 = vector.extract_strided_slice %39 {offsets = [0, 256], sizes = [256, 128], strides = [1, 1]} : vector<256x512xf32> to vector<256x128xf32>
    %44 = arith.maximumf %42, %43 : vector<256x128xf32>
    %45 = vector.extract_strided_slice %39 {offsets = [0, 384], sizes = [256, 128], strides = [1, 1]} : vector<256x512xf32> to vector<256x128xf32>
    %46 = arith.maximumf %44, %45 : vector<256x128xf32>
    %c0_i32 = arith.constant 0 : i32
    %47 = arith.cmpi eq, %arg1, %c0_i32 : i32
    %48 = arith.extui %47 : i1 to i32
    %c0_i32_17 = arith.constant 0 : i32
    %49 = arith.cmpi ne, %48, %c0_i32_17 : i32
    scf.if %49 {
      %cst_24 = arith.constant 0xFF800000 : f32
      %56 = vector.broadcast %cst_24 : f32 to vector<1x256x128xf32>
      %c0_25 = arith.constant 0 : index
      %c0_26 = arith.constant 0 : index
      %c0_27 = arith.constant 0 : index
      %57 = vector.load %arg9[%c0_25, %c0_26, %c0_27] : memref<1x256x128xf32, #tpu.memory_space<vmem>>, vector<1x256x128xf32>
      tpu.vector_store %arg9[%c0_25, %c0_26, %c0_27], %56 {strides = array<i32>} : memref<1x256x128xf32, #tpu.memory_space<vmem>>, vector<1x256x128xf32>,
    } else {
    }
    %c0_18 = arith.constant 0 : index
    %c0_19 = arith.constant 0 : index
    %c0_20 = arith.constant 0 : index
    %50 = vector.load %arg9[%c0_18, %c0_19, %c0_20] : memref<1x256x128xf32, #tpu.memory_space<vmem>>, vector<1x256x128xf32>
    %51 = vector.shape_cast %50 : vector<1x256x128xf32> to vector<256x128xf32>
    %52 = arith.maximumf %51, %46 : vector<256x128xf32>
    %c0_21 = arith.constant 0 : index
    %c0_22 = arith.constant 0 : index
    %c0_23 = arith.constant 0 : index
    %53 = vector.load %arg9[%c0_21, %c0_22, %c0_23] : memref<1x256x128xf32, #tpu.memory_space<vmem>>, vector<1x256x128xf32>
    %54 = vector.shape_cast %53 : vector<1x256x128xf32> to vector<256x128xf32>
    %55 = vector.shape_cast %52 : vector<256x128xf32> to vector<1x256x128xf32>
    tpu.vector_store %arg9[%c0_21, %c0_22, %c0_23], %55 {strides = array<i32>} : memref<1x256x128xf32, #tpu.memory_space<vmem>>, vector<1x256x128xf32>,
    return
  }
  func.func @transform_0(%arg0: i32, %arg1: i32) -> (i32, i32, i32) {
    %c0_i32 = arith.constant 0 : i32
    %c0_i32_0 = arith.constant 0 : i32
    return %arg0, %c0_i32, %arg1 : i32, i32, i32
  }
  func.func @transform_1(%arg0: i32, %arg1: i32) -> (i32, i32) {
    %c0_i32 = arith.constant 0 : i32
    %c0_i32_0 = arith.constant 0 : i32
    %c0_i32_1 = arith.constant 0 : i32
    return %c0_i32, %c0_i32_0 : i32, i32
  }
  func.func @transform_2(%arg0: i32, %arg1: i32) -> (i32, i32) {
    %c0_i32 = arith.constant 0 : i32
    %c0_i32_0 = arith.constant 0 : i32
    %c0_i32_1 = arith.constant 0 : i32
    return %c0_i32, %c0_i32_0 : i32, i32
  }
  func.func @transform_3(%arg0: i32, %arg1: i32) -> (i32, i32) {
    %c0_i32 = arith.constant 0 : i32
    %c0_i32_0 = arith.constant 0 : i32
    %c0_i32_1 = arith.constant 0 : i32
    return %c0_i32, %c0_i32_0 : i32, i32
  }
  func.func @transform_4(%arg0: i32, %arg1: i32) -> (i32, i32) {
    %c0_i32 = arith.constant 0 : i32
    %c0_i32_0 = arith.constant 0 : i32
    %c0_i32_1 = arith.constant 0 : i32
    return %c0_i32, %c0_i32_0 : i32, i32
  }
  func.func @transform_5(%arg0: i32, %arg1: i32) -> (i32, i32) {
    %c0_i32 = arith.constant 0 : i32
    %c0_i32_0 = arith.constant 0 : i32
    %c0_i32_1 = arith.constant 0 : i32
    return %c0_i32, %c0_i32_0 : i32, i32
  }
  func.func @transform_6(%arg0: i32, %arg1: i32) -> (i32, i32) {
    %c0_i32 = arith.constant 0 : i32
    %c0_i32_0 = arith.constant 0 : i32
    %c0_i32_1 = arith.constant 0 : i32
    return %c0_i32, %c0_i32_0 : i32, i32
  }
  func.func @transform_7(%arg0: i32, %arg1: i32) -> (i32, i32, i32) {
    %c0_i32 = arith.constant 0 : i32
    %c0_i32_0 = arith.constant 0 : i32
    %c0_i32_1 = arith.constant 0 : i32
    return %arg0, %c0_i32, %c0_i32_0 : i32, i32, i32
  }
}

</mosaic_0001>

<bundles_post_ra>
// kernel: tpu_custom_call.1
= control target key start
LH: loop header
LB: loop body
LE: loop exit
PB: predicated region body
PF: predicated region fallthrough
CT: control target
= control target key end

     0   :  { %12 = vsyncpa [#allocation3], 0  ;;  %s3552_s0 = inlined_call_operand.vmem [shape: bf16[4,3,512], index: 0, kind: input, shape index: {}]   ;;  %s3553_s1 = inlined_call_operand.vmem [shape: f32[64,3], index: 1, kind: input, shape index: {}]   ;;  %s3554_s2 = inlined_call_operand.vmem [shape: f32[64,1], index: 2, kind: input, shape index: {}]   ;;  %s3555_s3 = inlined_call_operand.vmem [shape: bf16[128,64], index: 3, kind: input, shape index: {}]   ;;  %s3556_s4 = inlined_call_operand.vmem [shape: f32[128,1], index: 4, kind: input, shape index: {}]   ;;  %s3557_s5 = inlined_call_operand.vmem [shape: bf16[256,128], index: 5, kind: input, shape index: {}]   ;;  %s3558_s6 = inlined_call_operand.vmem [shape: f32[256,1], index: 6, kind: input, shape index: {}]   ;;  %s3559_s7 = inlined_call_operand.hbm [shape: f32[4,256,128], index: 7, kind: output, shape index: {}]  }
   0x1   :  { %14 = vsyncpa [#allocation3 + $0x1], 0  ;;  %s2626_s24 = smov 0   ;;  %s2628_s25 = smov 0  }
   0x2   :  { %s2630_s26 = smov 0   ;;  %s2632_s27 = smov 0  }
   0x3   :  { %s2634_s28 = smov 0   ;;  %s2636_s29 = smov 0  }
   0x4 LB: > { %s2342_s30 = sadd.s32 4294967295, %s2578_s29   ;;  %s2343_s8 = sadd.s32 4294967294, %s2578_s29   ;;  %s2578_s29 = sphi %s2636_s29, %s20_s29   ;;  %s2574_s28 = sphi %s2634_s28, %s3611_s28   ;;  %s2570_s27 = sphi %s2632_s27, %s3610_s27   ;;  %s2566_s26 = sphi %s2630_s26, %s3609_s26   ;;  %s2562_s25 = sphi %s2628_s25, %s3608_s25   ;;  %s2558_s24 = sphi %s2626_s24, %s3607_s24  }
   0x5   : > { %s32_s9 = sadd.s32 1, %s2574_s28  ;;  %s193_s10 = sadd.s32 1, %s2566_s26 }
   0x6   : > { %p34_p0 = scmp.ge.s32.totalorder %s32_s9, 4  ;;  %p203_p1 = scmp.ne.s32.totalorder %s2566_s26, %s2562_s25 }
   0x7   : > { %p204_p2 = scmp.eq.s32.totalorder %s2342_s30, 3  ;;  %p209_p3 = scmp.ne.s32.totalorder %s2562_s25, %s2558_s24 }
   0x8   : > { %s3613_s9 = smov (%p34_p0, %s32_s9), 0  ;;  %p210_p5 = scmp.eq.s32.totalorder %s2343_s8, 3 }
   0x9   : > { %p2666_p4 = por %p204_p2, %p203_p1  ;;  %s190_s12 = ssub.s32 %s2574_s28, %s3613_s9 }
   0xa   : > { %p2346_p6 = scmp.ge.s32.totalorder %s2578_s29, 1  ;;  %p191_p7 = scmp.eq.s32.totalorder %s190_s12, 0 }
   0xb   : > { %p2673_p8 = por %p210_p5, %p209_p3  ;;  %p259_p9 = scmp.lt.s32.totalorder %s2578_s29, 5 }
   0xc   : > { %s2679_s14 = scalar_select %p191_p7, %s2566_s26, %s193_s10  }
   0xd   : > { %p260_p10 = pnand %p2346_p6, %p259_p9 }
   0xf   : > { %263 = sbr.rel (%p260_p10) target bundleno = 878 (0x36e), region = 48 }
  0x14   : > { %v323_v0 = vld [vmem:[%s3554_s2 + $0x30] sm:$0xff]  ;;  %v3560_v2 = vmov 0   ;;  %v324_v3 = vld [vmem:[%s3554_s2 + $0x38] sm:$0xff]  ;;  %v314_v5 = vld [vmem:[%s3553_s1 + $0x28] sm:$0xff]  ;;  %v2581_v7 = vmov 1   ;;  %v2582_v11 = vmov 2   ;;  %v367_v22 = vlaneseq }
  0x15   : > { %v315_v1 = vld [vmem:[%s3553_s1 + $0x30] sm:$0xff]  ;;  %2459 = vset.pattern.permute.xlu1 %v3560_v2  ;;  %2458 = vset.pattern.permute.xlu0 %v3560_v2  ;;  %v316_v4 = vld [vmem:[%s3553_s1 + $0x38] sm:$0xff]  ;;  %v321_v6 = vld [vmem:[%s3554_s2 + $0x20] sm:$0xff]  ;;  %p296_p11 = scmp.lt.s32.totalorder %s2570_s27, 3  ;;  %vm971_vm0 = vcmask 523264   ;;  %s292_s12 = sand.u32 1, %s2562_s25  }
  0x16   : > { %467 = vperm.xlu1 %2459, %v323_v0   ;;  %357 = vperm.xlu0 %2458, %v315_v1   ;;  %v313_v8 = vld [vmem:[%s3553_s1 + $0x20] sm:$0xff]  ;;  %v312_v9 = vld [vmem:[%s3553_s1 + $0x18] sm:$0xff]  ;;  %v319_v10 = vld [vmem:[%s3554_s2 + $0x10] sm:$0xff]  ;;  %v368_v27 = vshrl.u32 %v367_v22, 7  ;;  %s2347_s15 = sshll.u32 %s292_s12, 8  ;;  %s2396_s17 = sshll.u32 %s2570_s27, 12 }
  0x17   : > { %1028 = vmatprep.mubr.bf16.mxu0 %v3560_v2  ;;  %1141 = vmatprep.mubr.bf16.mxu1 %v3560_v2  ;;  %v310_v12 = vld [vmem:[%s3553_s1 + $0x8] sm:$0xff]  ;;  %v317_v14 = vld [vmem:[%s3554_s2] sm:$0xff]  ;;  %v311_v15 = vld [vmem:[%s3553_s1 + $0x10] sm:$0xff]  ;;  %s297_s23 = scalar_select %p296_p11, %s2570_s27, 3 }
  0x18   : > { %v322_v13 = vld [vmem:[%s3554_s2 + $0x28] sm:$0xff]  ;;  %v309_v16 = vld [vmem:[%s3553_s1] sm:$0xff]  ;;  %v320_v17 = vld [vmem:[%s3554_s2 + $0x18] sm:$0xff]  ;;  %v369_v31 = vsub.s32 0, %v368_v27  ;;  %v373_v32 = vsub.s32 4, %v368_v27  ;;  %v545_v43 = vsub.s32 5, %v368_v27  ;;  %s3500_s21 = scalar_lea.hbm %s3559_s7, %s2396_s17 }
  0x19   : > { %v318_v18 = vld [vmem:[%s3554_s2 + $0x8] sm:$0xff]  ;;  %v849_v19 = vld [vmem:[%s3556_s4 + $0x70] sm:$0xff]  ;;  %s2395_s30 = sshll.u32 %s297_s23, 3  ;;  %v850_v23 = vld [vmem:[%s3556_s4 + $0x78] sm:$0xff]  ;;  %v541_v44 = vsub.s32 1, %v368_v27  ;;  %v673_v46 = vsub.s32 2, %v368_v27 }
  0x1a   : > { %472 = vperm.xlu1 %2459, %v324_v3   ;;  %362 = vperm.xlu0 %2458, %v316_v4   ;;  %s303_s16 = scalar_lea.vmem %s3552_s0, %s2395_s30  ;;  %v848_v26 = vld [vmem:[%s3556_s4 + $0x68] sm:$0xff]  ;;  %v845_v35 = vld [vmem:[%s3556_s4 + $0x50] sm:$0xff]  ;;  %v843_v37 = vld [vmem:[%s3556_s4 + $0x40] sm:$0xff]  ;;  %v677_v47 = vsub.s32 6, %v368_v27  ;;  %s3507_s22 = scalar_lea.sflag [#allocation3], %s292_s12 }
  0x1b   : > { %v306_v28 = vld [vmem:[%s303_s16] sm:$0xff]  ;;  %v841_v56 = vld [vmem:[%s3556_s4 + $0x30] sm:$0xff]  ;;  %v846_v63 = vld [vmem:[%s3556_s4 + $0x58] sm:$0xff]  ;;  %s3462_s16 = scalar_lea.vmem [#allocation2], %s2347_s15  ;;  %s2583_s27 = smov [#allocation2]  }
  0x1c   : > { %v307_v33 = vunpack.c.l.bf16 %v306_v28  ;;  %v308_v34 = vunpack.c.h.bf16 %v306_v28  ;;  %v847_v55 = vld [vmem:[%s3556_s4 + $0x60] sm:$0xff]  ;;  %s2266_s18 = sshll.u32 %s3462_s16, 4  ;;  %s2506_s30 = sshll.u32 %s2583_s27, 4  ;;  %s3502_s18 = int_to_ptr.vmem [resolvable:$true] %s2266_s18  ;;  %s2507_s30 = int_to_ptr.vmem [resolvable:$false] %s2506_s30 }
  0x1d   : > { %s2502_s23 = scalar_lea.vmem %s3502_s18, 4096  ;;  %s2508_s8 = scalar_lea.vmem %s2507_s30, 8192 }
  0x1e   : > { %2460 = vset.pattern.permute.xlu1 %v2581_v7  ;;  %352 = vperm.xlu0 %2458, %v314_v5   ;;  %v370_v38 = vrot.slane %v307_v33, %v369_v31  ;;  %v374_v39 = vrot.slane %v307_v33, %v373_v32  ;;  %v378_v40 = vrot.slane %v308_v34, %v369_v31  ;;  %p2503_p12 = scmp.ne.s32.totalorder %s3502_s18, %s2502_s23  ;;  %p2509_p1 = scmp.lt.s32.totalorder %s3502_s18, %s2507_s30 }
  0x1f   : > { %536 = vperm.xlu1 %2460, %v316_v4   ;;  %v382_v42 = vrot.slane %v308_v34, %v373_v32  ;;  %v546_v52 = vrot.slane %v307_v33, %v545_v43  ;;  %v554_v53 = vrot.slane %v308_v34, %v545_v43  ;;  %v542_v57 = vrot.slane %v307_v33, %v541_v44  ;;  %v844_v32 = vld [vmem:[%s3556_s4 + $0x48] sm:$0xff]  ;;  %p2510_p2 = scmp.lt.s32.totalorder %s2508_s8, %s2502_s23 }
  0x20   : > { %v2775_v48 = vrot.slane %v370_v38, %v369_v31  ;;  %v2777_v49 = vrot.slane %v374_v39, %v369_v31  ;;  %v2779_v50 = vrot.slane %v378_v40, %v369_v31  ;;  %v550_v58 = vrot.slane %v308_v34, %v541_v44  ;;  %p2504_p13 = pnand %p2503_p12, %p2666_p4 }
  0x21   : > { %v2781_v51 = vrot.slane %v382_v42, %v369_v31  ;;  %v674_v60 = vrot.slane %v307_v33, %v673_v46  ;;  %v682_v61 = vrot.slane %v308_v34, %v673_v46  ;;  %v678_v62 = vrot.slane %v307_v33, %v677_v47  ;;  %v837_v33 = vld [vmem:[%s3556_s4 + $0x10] sm:$0xff]  ;;  %p2511_p3 = por %p2510_p2, %p2509_p1 }
  0x22   : > { %457 = vperm.xlu0 %2458, %v321_v6   ;;  %p2505_p0 = pneg %p2504_p13 }
  0x23   : > { %2461 = vset.pattern.permute.xlu1 %v3560_v2 }
  0x24   : > { %347 = vperm.xlu1 %2461, %v313_v8   ;;  %p2512_p5 = pnand %p2511_p3, %p2505_p0 }
  0x26   : > { %342 = vperm.xlu0 %2458, %v312_v9  }
  0x28   : > { %2462 = vset.pattern.permute.xlu1 %v2582_v11 }
  0x29   : > { %664 = vperm.xlu1 %2462, %v315_v1  }
  0x2a   : > { %447 = vperm.xlu0 %2458, %v319_v10  }
  0x2d   : > { %668 = vperm.xlu1 %2462, %v316_v4   ;;  %v686_v4 = vrot.slane %v308_v34, %v677_v47 }
  0x2e   : > { %332 = vperm.xlu0 %2458, %v310_v12  }
  0x31   : > { %2463 = vset.pattern.permute.xlu1 %v3560_v2 }
  0x32   : > { %462 = vperm.xlu1 %2463, %v322_v13   ;;  %437 = vperm.xlu0 %2458, %v317_v14   ;;  %v2810_v13 = vrot.slane %v542_v57, %v541_v44  ;;  %v2812_v14 = vrot.slane %v550_v58, %v541_v44 }
  0x36   : > { %2464 = vset.pattern.permute.xlu1 %v2581_v7  ;;  %2471 = vset.pattern.permute.xlu0 %v2581_v7 }
  0x37   : > { %528 = vperm.xlu1 %2464, %v314_v5   ;;  %532 = vperm.xlu0 %2471, %v315_v1  }
  0x3b   : > { %2465 = vset.pattern.permute.xlu1 %v3560_v2  ;;  %524 = vperm.xlu0 %2471, %v313_v8  }
  0x3c   : > { %337 = vperm.xlu1 %2465, %v311_v15  }
  0x3f   : > { %516 = vperm.xlu0 %2471, %v311_v15  }
  0x40   : > { %2466 = vset.pattern.permute.xlu1 %v2582_v11 }
  0x41   : > { %656 = vperm.xlu1 %2466, %v313_v8   ;;  %v2804_v8 = vrot.slane %v546_v52, %v541_v44 }
  0x43   : > { %508 = vperm.xlu0 %2471, %v309_v16  }
  0x45   : > { %660 = vperm.xlu1 %2466, %v314_v5   ;;  %v839_v5 = vld [vmem:[%s3556_s4 + $0x20] sm:$0xff] }
  0x47   : > { %2475 = vset.pattern.permute.xlu0 %v2582_v11 }
  0x48   : > { %644 = vperm.xlu0 %2475, %v310_v12  }
  0x49   : > { %2467 = vset.pattern.permute.xlu1 %v3560_v2 }
  0x4a   : > { %452 = vperm.xlu1 %2467, %v320_v17   ;;  %v2817_v17 = vrot.slane %v674_v60, %v673_v46 }
  0x4c   : > { %2477 = vset.pattern.permute.xlu0 %v3560_v2 }
  0x4d   : > { %913 = vperm.xlu0 %2477, %v847_v55  }
  0x4e   : > { %2468 = vset.pattern.permute.xlu1 %v2581_v7 }
  0x4f   : > { %520 = vperm.xlu1 %2468, %v312_v9  }
  0x51   : > { %908 = vperm.xlu0 %2477, %v846_v63  }
  0x53   : > { %2469 = vset.pattern.permute.xlu1 %v3560_v2 }
  0x54   : > { %327 = vperm.xlu1 %2469, %v309_v16  }
  0x55   : > { %898 = vperm.xlu0 %2477, %v844_v32  }
  0x58   : > { %2470 = vset.pattern.permute.xlu1 %v2582_v11 }
  0x59   : > { %648 = vperm.xlu1 %2470, %v311_v15  }
  0x5d   : > { %652 = vperm.xlu1 %2470, %v312_v9   ;;  %v2806_v9 = vrot.slane %v554_v53, %v541_v44 }
  0x61   : > { %2472 = vset.pattern.permute.xlu1 %v3560_v2 }
  0x62   : > { %442 = vperm.xlu1 %2472, %v318_v18   ;;  %v2819_v18 = vrot.slane %v682_v61, %v673_v46 }
  0x66   : > { %2473 = vset.pattern.permute.xlu1 %v2581_v7 }
  0x67   : > { %512 = vperm.xlu1 %2473, %v310_v12  }
  0x6b   : > { %2474 = vset.pattern.permute.xlu1 %v2582_v11 }
  0x6c   : > { %640 = vperm.xlu1 %2474, %v309_v16  }
  0x70   : > { %2476 = vset.pattern.permute.xlu1 %v3560_v2 }
  0x71   : > { %923 = vperm.xlu1 %2476, %v849_v19   ;;  %v2821_v19 = vrot.slane %v678_v62, %v673_v46 }
  0x75   : > { %928 = vperm.xlu1 %2476, %v850_v23   ;;  %v2829_v23 = vrot.slane %v686_v4, %v673_v46 }
  0x79   : > { %918 = vperm.xlu1 %2476, %v848_v26  }
  0x7d   : > { %903 = vperm.xlu1 %2476, %v845_v35  }
  0x81   : > { %893 = vperm.xlu1 %2476, %v843_v37  }
  0x85   : > { %883 = vperm.xlu1 %2476, %v841_v56  }
  0x89   : > { %873 = vperm.xlu1 %2476, %v839_v5  }
  0x8d   : > { %863 = vperm.xlu1 %2476, %v837_v33  }
  0x91   : > { %v2746_v20 = vpop.permute.xlu1 %467  ;;  %v358_v21 = vpop.permute.xlu0 %357 }
  0x92   : > { %v427_v0 = vmul.f32 %v2775_v48, %v358_v21  ;;  %v428_v1 = vmul.f32 %v2777_v49, %v358_v21  ;;  %v429_v3 = vmul.f32 %v2779_v50, %v358_v21  ;;  %v430_v6 = vmul.f32 %v2781_v51, %v358_v21 }
  0x94   : > { %v2824_v21 = vadd.f32 %v2746_v20, %v427_v0  ;;  %v2827_v22 = vadd.f32 %v2746_v20, %v429_v3  ;;  %v2832_v26 = vadd.f32 %v2746_v20, %v428_v1  ;;  %v2840_v31 = vadd.f32 %v2746_v20, %v430_v6 }
  0x95   : > { %v2754_v24 = vpop.permute.xlu1 %472  ;;  %v363_v25 = vpop.permute.xlu0 %362 }
  0x96   : > { %v431_v7 = vmul.f32 %v2775_v48, %v363_v25  ;;  %v432_v11 = vmul.f32 %v2777_v49, %v363_v25  ;;  %v433_v12 = vmul.f32 %v2779_v50, %v363_v25  ;;  %v434_v16 = vmul.f32 %v2781_v51, %v363_v25 }
  0x98   : > { %v503_v25 = vadd.f32 %v2754_v24, %v431_v7  ;;  %v505_v34 = vadd.f32 %v2754_v24, %v433_v12  ;;  %v504_v39 = vadd.f32 %v2754_v24, %v432_v11  ;;  %v506_v44 = vadd.f32 %v2754_v24, %v434_v16  ;;  %v835_v24 = vld [vmem:[%s3556_s4] sm:$0xff] }
  0x99   : > { %v2759_v29 = vpop.permute.xlu0 %352  ;;  %853 = vperm.xlu1 %2476, %v835_v24  }
  0x9a   : > { %v2761_v30 = vpop.permute.xlu1 %536  ;;  %v423_v46 = vmul.f32 %v2775_v48, %v2759_v29  ;;  %v424_v47 = vmul.f32 %v2777_v49, %v2759_v29  ;;  %v425_v55 = vmul.f32 %v2779_v50, %v2759_v29  ;;  %v426_v56 = vmul.f32 %v2781_v51, %v2759_v29  ;;  %v840_v29 = vld [vmem:[%s3556_s4 + $0x28] sm:$0xff] }
  0x9b   : > { %v604_v27 = vmul.f32 %v2804_v8, %v2761_v30  ;;  %v606_v28 = vmul.f32 %v2806_v9, %v2761_v30  ;;  %v603_v35 = vmul.f32 %v2810_v13, %v2761_v30  ;;  %v605_v37 = vmul.f32 %v2812_v14, %v2761_v30  ;;  %v842_v30 = vld [vmem:[%s3556_s4 + $0x38] sm:$0xff] }
  0x9c   : > { %888 = vperm.xlu0 %2477, %v842_v30  }
  0x9d   : > { %v2766_v36 = vpop.permute.xlu0 %457  ;;  %v636_v57 = vadd.f32 %v604_v27, %v504_v39  ;;  %v638_v58 = vadd.f32 %v606_v28, %v506_v44  ;;  %v635_v62 = vadd.f32 %v603_v35, %v503_v25  ;;  %v637_v63 = vadd.f32 %v605_v37, %v505_v34 }
  0x9f   : > { %v2771_v41 = vpop.permute.xlu1 %347 }
  0xa0   : > { %v419_v40 = vmul.f32 %v2775_v48, %v2771_v41  ;;  %v420_v42 = vmul.f32 %v2777_v49, %v2771_v41  ;;  %v421_v52 = vmul.f32 %v2779_v50, %v2771_v41  ;;  %v422_v53 = vmul.f32 %v2781_v51, %v2771_v41  ;;  %878 = vperm.xlu0 %2477, %v840_v29  }
  0xa1   : > { %v2773_v45 = vpop.permute.xlu0 %342 }
  0xa2   : > { %v491_v41 = vadd.f32 %v2766_v36, %v419_v40  ;;  %v492_v0 = vadd.f32 %v2766_v36, %v420_v42  ;;  %v493_v6 = vadd.f32 %v2766_v36, %v421_v52  ;;  %v494_v7 = vadd.f32 %v2766_v36, %v422_v53 }
  0xa4   : > { %v2783_v54 = vpop.permute.xlu1 %664 }
  0xa5   : > { %v2791_v59 = vpop.permute.xlu0 %447  ;;  %v731_v11 = vmul.f32 %v2817_v17, %v2783_v54  ;;  %v733_v12 = vmul.f32 %v2819_v18, %v2783_v54  ;;  %v732_v36 = vmul.f32 %v2821_v19, %v2783_v54  ;;  %v734_v32 = vmul.f32 %v2829_v23, %v2783_v54 }
  0xa8   : > { %v669_v10 = vpop.permute.xlu1 %668 }
  0xa9   : > { %v2814_v15 = vpop.permute.xlu0 %332  ;;  %v736_v43 = vmul.f32 %v2821_v19, %v669_v10  ;;  %v735_v60 = vmul.f32 %v2817_v17, %v669_v10  ;;  %v738_v61 = vmul.f32 %v2829_v23, %v669_v10  ;;  %v737_v1 = vmul.f32 %v2819_v18, %v669_v10  ;;  %v1350_v10 = vld [vmem:[%s3558_s6] sm:$0xff] }
  0xaa   : > { %1384 = vperm.xlu1 %2476, %v1350_v10   ;;  %v1354_v10 = vld [vmem:[%s3558_s6 + $0x20] sm:$0xff] }
  0xab   : > { %v2887_v5 = vadd.f32 %v736_v43, %v636_v57  ;;  %v2909_v33 = vadd.f32 %v738_v61, %v638_v58  ;;  %v2911_v34 = vadd.f32 %v735_v60, %v635_v62  ;;  %v769_v42 = vadd.f32 %v737_v1, %v637_v63  ;;  %v838_v43 = vld [vmem:[%s3556_s4 + $0x18] sm:$0xff] }
  0xac   : > { %868 = vperm.xlu0 %2477, %v838_v43  }
  0xad   : > { %v2853_v38 = vpop.permute.xlu1 %462  ;;  %v2855_v20 = vpop.permute.xlu0 %437  ;;  %v800_v40 = vmax.f32 %v2887_v5, 0.0  ;;  %v802_v1 = vmax.f32 %v2909_v33, 0.0 }
  0xae   : > { %v495_v35 = vadd.f32 %v2853_v38, %v423_v46  ;;  %v496_v37 = vadd.f32 %v2853_v38, %v424_v47  ;;  %v498_v54 = vadd.f32 %v2853_v38, %v426_v56  ;;  %v1352_v47 = vld [vmem:[%s3558_s6 + $0x10] sm:$0xff]  ;;  %v497_v63 = vadd.f32 %v2853_v38, %v425_v55 }
  0xaf   : > { %1394 = vperm.xlu1 %2476, %v1352_v47  }
  0xb2   : > { %v529_v3 = vpop.permute.xlu1 %528  ;;  %v533_v4 = vpop.permute.xlu0 %532 }
  0xb3   : > { %v599_v16 = vmul.f32 %v2810_v13, %v533_v4  ;;  %v600_v25 = vmul.f32 %v2804_v8, %v533_v4  ;;  %v601_v27 = vmul.f32 %v2812_v14, %v533_v4  ;;  %v602_v28 = vmul.f32 %v2806_v9, %v533_v4  ;;  %1404 = vperm.xlu1 %2476, %v1354_v10  }
  0xb4   : > { %v595_v44 = vmul.f32 %v2810_v13, %v529_v3  ;;  %v596_v30 = vmul.f32 %v2804_v8, %v529_v3  ;;  %v598_v52 = vmul.f32 %v2806_v9, %v529_v3 }
  0xb5   : > { %v632_v53 = vadd.f32 %v600_v25, %v2832_v26  ;;  %v634_v24 = vadd.f32 %v602_v28, %v2840_v31  ;;  %v631_v57 = vadd.f32 %v599_v16, %v2824_v21  ;;  %v633_v56 = vadd.f32 %v601_v27, %v2827_v22  ;;  %v836_v21 = vld [vmem:[%s3556_s4 + $0x8] sm:$0xff] }
  0xb6   : > { %v525_v39 = vpop.permute.xlu0 %524  ;;  %v799_v26 = vmax.f32 %v2911_v34, 0.0  ;;  %v801_v31 = vmax.f32 %v769_v42, 0.0  ;;  %v597_v22 = vmul.f32 %v2812_v14, %v529_v3  ;;  %v627_v4 = vadd.f32 %v595_v44, %v495_v35  ;;  %858 = vperm.xlu0 %2477, %v836_v21  }
  0xb7   : > { %v2923_v46 = vpop.permute.xlu1 %337  ;;  %v591_v58 = vmul.f32 %v2810_v13, %v525_v39  ;;  %v592_v60 = vmul.f32 %v2804_v8, %v525_v39  ;;  %v593_v61 = vmul.f32 %v2812_v14, %v525_v39  ;;  %v594_v62 = vmul.f32 %v2806_v9, %v525_v39 }
  0xb8   : > { %v628_v5 = vadd.f32 %v596_v30, %v496_v37  ;;  %v630_v29 = vadd.f32 %v598_v52, %v498_v54  ;;  %v764_v55 = vadd.f32 %v732_v36, %v632_v53  ;;  %v766_v16 = vadd.f32 %v734_v32, %v634_v24  ;;  %v1351_v36 = vld [vmem:[%s3558_s6 + $0x8] sm:$0xff] }
  0xb9   : > { %v763_v25 = vadd.f32 %v731_v11, %v631_v57  ;;  %v765_v27 = vadd.f32 %v733_v12, %v633_v56  ;;  %v623_v28 = vadd.f32 %v591_v58, %v491_v41  ;;  %v624_v33 = vadd.f32 %v592_v60, %v492_v0  ;;  %v1353_v60 = vld [vmem:[%s3558_s6 + $0x18] sm:$0xff] }
  0xba   : > { %v625_v34 = vadd.f32 %v593_v61, %v493_v6  ;;  %v626_v39 = vadd.f32 %v594_v62, %v494_v7  ;;  %v796_v11 = vmax.f32 %v764_v55, 0.0  ;;  %v798_v12 = vmax.f32 %v766_v16, 0.0  ;;  %v1356_v6 = vld [vmem:[%s3558_s6 + $0x30] sm:$0xff]  ;;  %1389 = vperm.xlu0 %2477, %v1351_v36   ;;  %v1362_v36 = vld [vmem:[%s3558_s6 + $0x60] sm:$0xff] }
  0xbb   : > { %v795_v41 = vmax.f32 %v763_v25, 0.0  ;;  %v797_v0 = vmax.f32 %v765_v27, 0.0  ;;  %1414 = vperm.xlu1 %2476, %v1356_v6   ;;  %v629_v61 = vadd.f32 %v597_v22, %v497_v63  ;;  %v1355_v63 = vld [vmem:[%s3558_s6 + $0x28] sm:$0xff] }
  0xbc   : > { %v657_v38 = vpop.permute.xlu1 %656  ;;  %v832_v30 = vpack.c.bf16 %v800_v40, %v796_v11  ;;  %v834_v52 = vpack.c.bf16 %v802_v1, %v798_v12  ;;  %v1358_v40 = vld [vmem:[%s3558_s6 + $0x40] sm:$0xff]  ;;  %v413_v11 = vmul.f32 %v2779_v50, %v2923_v46  ;;  %v414_v12 = vmul.f32 %v2781_v51, %v2923_v46 }
  0xbd   : > { %v723_v42 = vmul.f32 %v2817_v17, %v657_v38  ;;  %v724_v3 = vmul.f32 %v2821_v19, %v657_v38  ;;  %v725_v35 = vmul.f32 %v2819_v18, %v657_v38  ;;  %v726_v37 = vmul.f32 %v2829_v23, %v657_v38 }
  0xbe   : > { %v831_v47 = vpack.c.bf16 %v799_v26, %v795_v41  ;;  %v833_v53 = vpack.c.bf16 %v801_v31, %v797_v0  ;;  %1004 = vmatprep.subr.bf16.mxu0 %v832_v30  ;;  %1117 = vmatprep.subr.bf16.mxu1 %v834_v52  ;;  %v417_v30 = vmul.f32 %v2779_v50, %v2773_v45 }
  0xbf   : > { %v756_v32 = vadd.f32 %v724_v3, %v624_v33  ;;  %v758_v43 = vadd.f32 %v726_v37, %v626_v39  ;;  %v755_v54 = vadd.f32 %v723_v42, %v623_v28  ;;  %v757_v44 = vadd.f32 %v725_v35, %v625_v34  ;;  %1399 = vperm.xlu0 %2477, %v1353_v60   ;;  %v1357_v35 = vld [vmem:[%s3558_s6 + $0x38] sm:$0xff]  ;;  %v517_v37 = vpop.permute.xlu0 %516 }
  0xc0   : > { %v661_v7 = vpop.permute.xlu1 %660  ;;  %1005 = vmatpush1.bf16.msra.mxu0 %v831_v47  ;;  %1118 = vmatpush1.bf16.msra.mxu1 %v833_v53  ;;  %v411_v39 = vmul.f32 %v2775_v48, %v2923_v46  ;;  %v412_v42 = vmul.f32 %v2777_v49, %v2923_v46  ;;  %v583_v6 = vmul.f32 %v2810_v13, %v517_v37 }
  0xc1   : > { %v727_v24 = vmul.f32 %v2817_v17, %v661_v7  ;;  %v728_v57 = vmul.f32 %v2821_v19, %v661_v7  ;;  %v729_v56 = vmul.f32 %v2819_v18, %v661_v7  ;;  %v730_v58 = vmul.f32 %v2829_v23, %v661_v7  ;;  %1424 = vperm.xlu1 %2476, %v1358_v40  }
  0xc2   : > { %v788_v10 = vmax.f32 %v756_v32, 0.0  ;;  %v790_v38 = vmax.f32 %v758_v43, 0.0  ;;  %v787_v55 = vmax.f32 %v755_v54, 0.0  ;;  %v789_v16 = vmax.f32 %v757_v44, 0.0  ;;  %v1359_v32 = vld [vmem:[%s3558_s6 + $0x48] sm:$0xff]  ;;  %v1364_v44 = vld [vmem:[%s3558_s6 + $0x70] sm:$0xff] }
  0xc3   : > { %v760_v62 = vadd.f32 %v728_v57, %v628_v5  ;;  %v762_v1 = vadd.f32 %v730_v58, %v630_v29  ;;  %v759_v26 = vadd.f32 %v727_v24, %v627_v4  ;;  %v761_v21 = vadd.f32 %v729_v56, %v629_v61  ;;  %v1360_v4 = vld [vmem:[%s3558_s6 + $0x50] sm:$0xff]  ;;  %1409 = vperm.xlu0 %2477, %v1355_v63  }
  0xc4   : > { %v483_v41 = vadd.f32 %v2791_v59, %v411_v39  ;;  %v484_v0 = vadd.f32 %v2791_v59, %v412_v42  ;;  %v584_v7 = vmul.f32 %v2804_v8, %v517_v37  ;;  %v415_v43 = vmul.f32 %v2775_v48, %v2773_v45 }
  0xc5   : > { %v2966_v31 = vpop.permute.xlu1 %452  ;;  %v792_v22 = vmax.f32 %v760_v62, 0.0  ;;  %v794_v25 = vmax.f32 %v762_v1, 0.0  ;;  %v791_v27 = vmax.f32 %v759_v26, 0.0  ;;  %v793_v28 = vmax.f32 %v761_v21, 0.0  ;;  %1434 = vperm.xlu1 %2476, %v1360_v4   ;;  %v1361_v62 = vld [vmem:[%s3558_s6 + $0x58] sm:$0xff]  ;;  %v509_v21 = vpop.permute.xlu0 %508 }
  0xc6   : > { %v416_v46 = vmul.f32 %v2777_v49, %v2773_v45  ;;  %v418_v52 = vmul.f32 %v2781_v51, %v2773_v45  ;;  %v3008_v47 = vmul.f32 %v2775_v48, %v2814_v15  ;;  %v3012_v53 = vmul.f32 %v2777_v49, %v2814_v15 }
  0xc7   : > { %v828_v5 = vpack.c.bf16 %v792_v22, %v788_v10  ;;  %v830_v29 = vpack.c.bf16 %v794_v25, %v790_v38  ;;  %v827_v33 = vpack.c.bf16 %v791_v27, %v787_v55  ;;  %v829_v34 = vpack.c.bf16 %v793_v28, %v789_v16  ;;  %1419 = vperm.xlu0 %2477, %v1357_v35   ;;  %v1366_v10 = vld [vmem:[%s3558_s6 + $0x80] sm:$0xff] }
  0xc8   : > { %v3016_v24 = vmul.f32 %v2779_v50, %v2814_v15  ;;  %v3020_v57 = vmul.f32 %v2781_v51, %v2814_v15  ;;  %v485_v56 = vadd.f32 %v2791_v59, %v413_v11  ;;  %v486_v45 = vadd.f32 %v2791_v59, %v414_v12 }
  0xc9   : > { %1006 = vmatprep.subr.bf16.mxu0 %v828_v5  ;;  %1119 = vmatprep.subr.bf16.mxu1 %v830_v29  ;;  %v585_v58 = vmul.f32 %v2812_v14, %v517_v37  ;;  %v586_v60 = vmul.f32 %v2806_v9, %v517_v37  ;;  %v615_v61 = vadd.f32 %v583_v6, %v483_v41  ;;  %v1368_v37 = vld [vmem:[%s3558_s6 + $0x90] sm:$0xff] }
  0xca   : > { %v521_v3 = vpop.permute.xlu1 %520  ;;  %1007 = vmatpush1.bf16.msra.mxu0 %v827_v33  ;;  %1120 = vmatpush1.bf16.msra.mxu1 %v829_v34  ;;  %v616_v40 = vadd.f32 %v584_v7, %v484_v0  ;;  %v487_v38 = vadd.f32 %v2966_v31, %v415_v43  ;;  %v488_v55 = vadd.f32 %v2966_v31, %v416_v46 }
  0xcb   : > { %1444 = vperm.xlu1 %2476, %v1362_v36   ;;  %1429 = vperm.xlu0 %2477, %v1359_v32   ;;  %v587_v1 = vmul.f32 %v2810_v13, %v521_v3  ;;  %v588_v15 = vmul.f32 %v2804_v8, %v521_v3  ;;  %v589_v26 = vmul.f32 %v2812_v14, %v521_v3 }
  0xcc   : > { %v590_v59 = vmul.f32 %v2806_v9, %v521_v3  ;;  %v489_v16 = vadd.f32 %v2966_v31, %v417_v30  ;;  %v490_v63 = vadd.f32 %v2966_v31, %v418_v52  ;;  %v617_v5 = vadd.f32 %v585_v58, %v485_v56  ;;  %v1363_v31 = vld [vmem:[%s3558_s6 + $0x68] sm:$0xff]  ;;  %v1365_v56 = vld [vmem:[%s3558_s6 + $0x78] sm:$0xff] }
  0xcd   : > { %v618_v29 = vadd.f32 %v586_v60, %v486_v45  ;;  %v3045_v33 = vmul.f32 %v2810_v13, %v509_v21  ;;  %v3048_v34 = vmul.f32 %v2804_v8, %v509_v21  ;;  %v619_v39 = vadd.f32 %v587_v1, %v487_v38 }
  0xce   : > { %v620_v42 = vadd.f32 %v588_v15, %v488_v55  ;;  %v621_v3 = vadd.f32 %v589_v26, %v489_v16  ;;  %v622_v35 = vadd.f32 %v590_v59, %v490_v63  ;;  %v578_v38 = vmul.f32 %v2806_v9, %v509_v21 }
  0xcf   : > { %v328_v54 = vpop.permute.xlu1 %327  ;;  %1454 = vperm.xlu1 %2476, %v1364_v44   ;;  %1439 = vperm.xlu0 %2477, %v1361_v62  }
  0xd0   : > { %v403_v46 = vmul.f32 %v2775_v48, %v328_v54  ;;  %v404_v44 = vmul.f32 %v2777_v49, %v328_v54  ;;  %v405_v30 = vmul.f32 %v2779_v50, %v328_v54  ;;  %v406_v52 = vmul.f32 %v2781_v51, %v328_v54  ;;  %v1370_v48 = vld [vmem:[%s3558_s6 + $0xa0] sm:$0xff] }
  0xd3   : > { %1464 = vperm.xlu1 %2476, %v1366_v10   ;;  %1449 = vperm.xlu0 %2477, %v1363_v31   ;;  %v577_v10 = vmul.f32 %v2812_v14, %v509_v21  ;;  %v1367_v21 = vld [vmem:[%s3558_s6 + $0x88] sm:$0xff]  ;;  %v477_v31 = vadd.f32 %v2855_v20, %v405_v30 }
  0xd4   : > { %v649_v22 = vpop.permute.xlu1 %648 }
  0xd5   : > { %v715_v25 = vmul.f32 %v2817_v17, %v649_v22  ;;  %v716_v27 = vmul.f32 %v2821_v19, %v649_v22  ;;  %v717_v28 = vmul.f32 %v2819_v18, %v649_v22  ;;  %v718_v4 = vmul.f32 %v2829_v23, %v649_v22 }
  0xd7   : > { %v748_v11 = vadd.f32 %v716_v27, %v616_v40  ;;  %v750_v12 = vadd.f32 %v718_v4, %v618_v29  ;;  %v747_v41 = vadd.f32 %v715_v25, %v615_v61  ;;  %v749_v0 = vadd.f32 %v717_v28, %v617_v5  ;;  %1474 = vperm.xlu1 %2476, %v1368_v37   ;;  %v645_v40 = vpop.permute.xlu0 %644 }
  0xd8   : > { %v653_v36 = vpop.permute.xlu1 %652  ;;  %1459 = vperm.xlu0 %2477, %v1365_v56   ;;  %v711_v55 = vmul.f32 %v2817_v17, %v645_v40  ;;  %v712_v16 = vmul.f32 %v2821_v19, %v645_v40  ;;  %v475_v28 = vadd.f32 %v2855_v20, %v403_v46  ;;  %v476_v4 = vadd.f32 %v2855_v20, %v404_v44 }
  0xd9   : > { %v719_v6 = vmul.f32 %v2817_v17, %v653_v36  ;;  %v720_v7 = vmul.f32 %v2821_v19, %v653_v36  ;;  %v721_v32 = vmul.f32 %v2819_v18, %v653_v36  ;;  %v722_v43 = vmul.f32 %v2829_v23, %v653_v36 }
  0xda   : > { %v780_v62 = vmax.f32 %v748_v11, 0.0  ;;  %v782_v49 = vmax.f32 %v750_v12, 0.0  ;;  %v779_v1 = vmax.f32 %v747_v41, 0.0  ;;  %v781_v50 = vmax.f32 %v749_v0, 0.0 }
  0xdb   : > { %v752_v45 = vadd.f32 %v720_v7, %v620_v42  ;;  %v754_v58 = vadd.f32 %v722_v43, %v622_v35  ;;  %v751_v60 = vadd.f32 %v719_v6, %v619_v39  ;;  %v753_v61 = vadd.f32 %v721_v32, %v621_v3  ;;  %1484 = vperm.xlu1 %2476, %v1370_v48   ;;  %v1372_v3 = vld [vmem:[%s3558_s6 + $0xb0] sm:$0xff] }
  0xdc   : > { %v713_v5 = vmul.f32 %v2819_v18, %v645_v40  ;;  %v714_v29 = vmul.f32 %v2829_v23, %v645_v40  ;;  %v478_v39 = vadd.f32 %v2855_v20, %v406_v52  ;;  %1469 = vperm.xlu0 %2477, %v1367_v21   ;;  %v609_v7 = vadd.f32 %v577_v10, %v477_v31  ;;  %v1378_v10 = vld [vmem:[%s3558_s6 + $0xe0] sm:$0xff]  ;;  %v2484_v21 = vld [vmem:[%s3555_s3 + $0x30] sm:$0xff]   ;;  %v2485_v31 = vld [vmem:[%s3555_s3 + $0x38] sm:$0xff]  }
  0xdd   : > { %v443_v15 = vpop.permute.xlu1 %442  ;;  %v784_v51 = vmax.f32 %v752_v45, 0.0  ;;  %v786_v54 = vmax.f32 %v754_v58, 0.0  ;;  %v783_v26 = vmax.f32 %v751_v60, 0.0  ;;  %v785_v59 = vmax.f32 %v753_v61, 0.0 }
  0xde   : > { %v479_v42 = vadd.f32 %v443_v15, %v3008_v47  ;;  %v480_v35 = vadd.f32 %v443_v15, %v3012_v53  ;;  %v481_v37 = vadd.f32 %v443_v15, %v3016_v24  ;;  %v482_v36 = vadd.f32 %v443_v15, %v3020_v57  ;;  %v1369_v53 = vld [vmem:[%s3558_s6 + $0x98] sm:$0xff] }
  0xdf   : > { %v824_v63 = vpack.c.bf16 %v784_v51, %v780_v62  ;;  %v826_v22 = vpack.c.bf16 %v786_v54, %v782_v49  ;;  %v823_v25 = vpack.c.bf16 %v783_v26, %v779_v1  ;;  %v825_v27 = vpack.c.bf16 %v785_v59, %v781_v50  ;;  %1494 = vperm.xlu1 %2476, %v1372_v3   ;;  %v1373_v15 = vld [vmem:[%s3558_s6 + $0xb8] sm:$0xff] }
  0xe0   : > { %1479 = vperm.xlu0 %2477, %v1369_v53  }
  0xe1   : > { %1008 = vmatprep.subr.bf16.mxu0 %v824_v63  ;;  %1121 = vmatprep.subr.bf16.mxu1 %v826_v22  ;;  %v1377_v63 = vld [vmem:[%s3558_s6 + $0xd8] sm:$0xff]  ;;  %v2479_v22 = vld [vmem:[%s3555_s3 + $0x8] sm:$0xff]  }
  0xe2   : > { %v513_v11 = vpop.permute.xlu1 %512  ;;  %1009 = vmatpush1.bf16.msra.mxu0 %v823_v25  ;;  %1122 = vmatpush1.bf16.msra.mxu1 %v825_v27  ;;  %v1379_v25 = vld [vmem:[%s3558_s6 + $0xe8] sm:$0xff]  ;;  %v1381_v27 = vld [vmem:[%s3558_s6 + $0xf8] sm:$0xff] }
  0xe3   : > { %v579_v12 = vmul.f32 %v2810_v13, %v513_v11  ;;  %v580_v20 = vmul.f32 %v2804_v8, %v513_v11  ;;  %v581_v47 = vmul.f32 %v2812_v14, %v513_v11  ;;  %v582_v41 = vmul.f32 %v2806_v9, %v513_v11  ;;  %v1374_v13 = vld [vmem:[%s3558_s6 + $0xc0] sm:$0xff] }
  0xe4   : > { %v607_v8 = vadd.f32 %v3045_v33, %v475_v28  ;;  %v608_v14 = vadd.f32 %v3048_v34, %v476_v4  ;;  %v610_v9 = vadd.f32 %v578_v38, %v478_v39  ;;  %1504 = vperm.xlu1 %2476, %v1374_v13   ;;  %v1371_v33 = vld [vmem:[%s3558_s6 + $0xa8] sm:$0xff]  ;;  %v1376_v34 = vld [vmem:[%s3558_s6 + $0xd0] sm:$0xff]  ;;  %v2478_v38 = vld [vmem:[%s3555_s3] sm:$0xff]  }
  0xe5   : > { %v611_v24 = vadd.f32 %v579_v12, %v479_v42  ;;  %v612_v0 = vadd.f32 %v580_v20, %v480_v35  ;;  %v613_v57 = vadd.f32 %v581_v47, %v481_v37  ;;  %v614_v6 = vadd.f32 %v582_v41, %v482_v36  ;;  %1489 = vperm.xlu0 %2477, %v1371_v33   ;;  %v2480_v28 = vld [vmem:[%s3555_s3 + $0x10] sm:$0xff]   ;;  %v2481_v4 = vld [vmem:[%s3555_s3 + $0x18] sm:$0xff]   ;;  %v3195_v35 = vpop.permute.xlu0 %913 }
  0xe7   : > { %v641_v32 = vpop.permute.xlu1 %640  ;;  %v744_v43 = vadd.f32 %v712_v16, %v612_v0  ;;  %v746_v46 = vadd.f32 %v714_v29, %v614_v6  ;;  %v743_v44 = vadd.f32 %v711_v55, %v611_v24  ;;  %v745_v30 = vadd.f32 %v713_v5, %v613_v57  ;;  %v1375_v55 = vld [vmem:[%s3558_s6 + $0xc8] sm:$0xff]  ;;  %v1380_v16 = vld [vmem:[%s3558_s6 + $0xf0] sm:$0xff]  ;;  %v2482_v5 = vld [vmem:[%s3555_s3 + $0x20] sm:$0xff]  }
  0xe8   : > { %v707_v52 = vmul.f32 %v2817_v17, %v641_v32  ;;  %v708_v56 = vmul.f32 %v2821_v19, %v641_v32  ;;  %v709_v45 = vmul.f32 %v2819_v18, %v641_v32  ;;  %v710_v58 = vmul.f32 %v2829_v23, %v641_v32  ;;  %1514 = vperm.xlu1 %2476, %v1376_v34   ;;  %v2483_v29 = vld [vmem:[%s3555_s3 + $0x28] sm:$0xff]  }
  0xe9   : > { %v776_v17 = vmax.f32 %v744_v43, 0.0  ;;  %v778_v62 = vmax.f32 %v746_v46, 0.0  ;;  %v775_v19 = vmax.f32 %v743_v44, 0.0  ;;  %v777_v49 = vmax.f32 %v745_v30, 0.0  ;;  %1499 = vperm.xlu0 %2477, %v1373_v15   ;;  %v3199_v36 = vpop.permute.xlu0 %908 }
  0xea   : > { %v740_v60 = vadd.f32 %v708_v56, %v608_v14  ;;  %v742_v61 = vadd.f32 %v710_v58, %v610_v9  ;;  %v739_v40 = vadd.f32 %v707_v52, %v607_v8  ;;  %v741_v48 = vadd.f32 %v709_v45, %v609_v7 }
  0xec   : > { %v772_v18 = vmax.f32 %v740_v60, 0.0  ;;  %v774_v23 = vmax.f32 %v742_v61, 0.0  ;;  %v771_v1 = vmax.f32 %v739_v40, 0.0  ;;  %v773_v50 = vmax.f32 %v741_v48, 0.0  ;;  %1524 = vperm.xlu1 %2476, %v1378_v10   ;;  %v3189_v39 = vpop.permute.xlu1 %923 }
  0xed   : > { %1509 = vperm.xlu0 %2477, %v1375_v55   ;;  %v3203_v12 = vpop.permute.xlu0 %898 }
  0xee   : > { %v820_v51 = vpack.c.bf16 %v776_v17, %v772_v18  ;;  %v822_v54 = vpack.c.bf16 %v778_v62, %v774_v23  ;;  %v819_v26 = vpack.c.bf16 %v775_v19, %v771_v1  ;;  %v821_v59 = vpack.c.bf16 %v777_v49, %v773_v50 }
  0xf0   : > { %1010 = vmatprep.subr.bf16.mxu0 %v820_v51  ;;  %1123 = vmatprep.subr.bf16.mxu1 %v822_v54  ;;  %v3191_v42 = vpop.permute.xlu1 %928 }
  0xf1   : > { %1011 = vmatpush1.bf16.msra.mxu0 %v819_v26  ;;  %1124 = vmatpush1.bf16.msra.mxu1 %v821_v59 }
  0xf2   : > { %1534 = vperm.xlu1 %2476, %v1380_v16   ;;  %1519 = vperm.xlu0 %2477, %v1377_v63  }
  0xf4   : > { %2358 = vmatmul.mubr.msk.bf16.vlgmr.msra.gmra.mxu0 %vm971_vm0, %v2478_v38  ;;  %2366 = vmatmul.mubr.msk.bf16.vlgmr.msra.gmra.mxu1 %vm971_vm0, %v2478_v38  ;;  %v3193_v3 = vpop.permute.xlu1 %918 }
  0xf5   : > { %1038 = vmatprep.mubr.bf16.mxu0 %v3560_v2  ;;  %1151 = vmatprep.mubr.bf16.mxu1 %v3560_v2 }
  0xf6   : > { %1529 = vperm.xlu0 %2477, %v1379_v25  }
  0xf8   : > { %v3197_v37 = vpop.permute.xlu1 %903 }
  0xfa   : > { %1539 = vperm.xlu0 %2477, %v1381_v27  }
  0xfc   : > { %2359 = vmatmul.mubr.msk.bf16.gmra.mxu0 %vm971_vm0, %v2479_v22  ;;  %2367 = vmatmul.mubr.msk.bf16.gmra.mxu1 %vm971_vm0, %v2479_v22  ;;  %v3201_v11 = vpop.permute.xlu1 %893 }
  0xfd   : > { %1048 = vmatprep.mubr.bf16.mxu0 %v3560_v2  ;;  %1161 = vmatprep.mubr.bf16.mxu1 %v3560_v2 }
 0x100   : > { %v3205_v20 = vpop.permute.xlu1 %883 }
 0x104   : > { %2360 = vmatmul.mubr.msk.bf16.gmra.mxu0 %vm971_vm0, %v2480_v28  ;;  %2368 = vmatmul.mubr.msk.bf16.gmra.mxu1 %vm971_vm0, %v2480_v28  ;;  %v3209_v41 = vpop.permute.xlu1 %873 }
 0x105   : > { %1058 = vmatprep.mubr.bf16.mxu0 %v3560_v2  ;;  %1171 = vmatprep.mubr.bf16.mxu1 %v3560_v2 }
 0x108   : > { %v864_v24 = vpop.permute.xlu1 %863 }
 0x10c   : > { %2361 = vmatmul.mubr.msk.bf16.gmra.mxu0 %vm971_vm0, %v2481_v4  ;;  %2369 = vmatmul.mubr.msk.bf16.gmra.mxu1 %vm971_vm0, %v2481_v4 }
 0x10d   : > { %1068 = vmatprep.mubr.bf16.mxu0 %v3560_v2  ;;  %1181 = vmatprep.mubr.bf16.mxu1 %v3560_v2 }
 0x114   : > { %2362 = vmatmul.mubr.msk.bf16.gmra.mxu0 %vm971_vm0, %v2482_v5  ;;  %2370 = vmatmul.mubr.msk.bf16.gmra.mxu1 %vm971_vm0, %v2482_v5  ;;  %v854_v57 = vpop.permute.xlu1 %853 }
 0x115   : > { %1078 = vmatprep.mubr.bf16.mxu0 %v3560_v2  ;;  %1191 = vmatprep.mubr.bf16.mxu1 %v3560_v2 }
 0x117   : > { %v3207_v47 = vpop.permute.xlu0 %888 }
 0x11b   : > { %v3211_v53 = vpop.permute.xlu0 %878 }
 0x11c   : > { %2363 = vmatmul.mubr.msk.bf16.gmra.mxu0 %vm971_vm0, %v2483_v29  ;;  %2371 = vmatmul.mubr.msk.bf16.gmra.mxu1 %vm971_vm0, %v2483_v29  ;;  %3566 = vst [vmem:[#allocation5_spill] sm:$0xff] %v3211_v53 }
 0x11d   : > { %1088 = vmatprep.mubr.bf16.mxu0 %v3560_v2  ;;  %1201 = vmatprep.mubr.bf16.mxu1 %v3560_v2 }
 0x124   : > { %2364 = vmatmul.mubr.msk.bf16.gmra.mxu0 %vm971_vm0, %v2484_v21  ;;  %2372 = vmatmul.mubr.msk.bf16.gmra.mxu1 %vm971_vm0, %v2484_v21 }
 0x125   : > { %1098 = vmatprep.mubr.bf16.mxu0 %v3560_v2  ;;  %1211 = vmatprep.mubr.bf16.mxu1 %v3560_v2 }
 0x127   : > { %v869_v0 = vpop.permute.xlu0 %868 }
 0x12c   : > { %2365 = vmatmul.mubr.msk.bf16.gmra.mxu0 %vm971_vm0, %v2485_v31  ;;  %2373 = vmatmul.mubr.msk.bf16.gmra.mxu1 %vm971_vm0, %v2485_v31 }
 0x12d   : > { %1670 = vmatprep.mubr.bf16.mxu0 %v3560_v2  ;;  %1863 = vmatprep.mubr.bf16.mxu1 %v3560_v2 }
 0x131   : > { %v859_v32 = vpop.permute.xlu0 %858 }
 0x1b4   : > { %v1030_v6 = vpop.f32.mrf.mxu0  ;;  %v1143_v13 = vpop.f32.mrf.mxu1 }
 0x1b5   : > { %v1144_v8 = vadd.f32 %v1143_v13, %v854_v57  ;;  %v1031_v14 = vadd.f32 %v1030_v6, %v854_v57 }
 0x1b6   : > { %v1032_v7 = vpop.f32.mrf.mxu0  ;;  %v1145_v9 = vpop.f32.mrf.mxu1 }
 0x1b7   : > { %v1033_v43 = vadd.f32 %v1032_v7, %v854_v57  ;;  %v1146_v46 = vadd.f32 %v1145_v9, %v854_v57  ;;  %v1224_v52 = vmax.f32 %v1144_v8, 0.0  ;;  %v1222_v58 = vmax.f32 %v1031_v14, 0.0 }
 0x1b8   : > { %v1034_v44 = vpop.f32.mrf.mxu0  ;;  %v1147_v30 = vpop.f32.mrf.mxu1 }
 0x1b9   : > { %v1035_v56 = vadd.f32 %v1034_v44, %v859_v32  ;;  %v1148_v45 = vadd.f32 %v1147_v30, %v859_v32  ;;  %v1223_v17 = vmax.f32 %v1033_v43, 0.0  ;;  %v1225_v62 = vmax.f32 %v1146_v46, 0.0 }
 0x1ba   : > { %v1036_v33 = vpop.f32.mrf.mxu0  ;;  %v1149_v34 = vpop.f32.mrf.mxu1 }
 0x1bb   : > { %v1226_v60 = vmax.f32 %v1035_v56, 0.0  ;;  %v1228_v61 = vmax.f32 %v1148_v45, 0.0  ;;  %v1037_v40 = vadd.f32 %v1036_v33, %v859_v32  ;;  %v1150_v48 = vadd.f32 %v1149_v34, %v859_v32 }
 0x1bc   : > { %v1040_v19 = vpop.f32.mrf.mxu0  ;;  %v1153_v49 = vpop.f32.mrf.mxu1 }
 0x1bd   : > { %v3213_v18 = vpack.c.bf16 %v1226_v60, %v1222_v58  ;;  %v3215_v23 = vpack.c.bf16 %v1228_v61, %v1224_v52  ;;  %v1227_v1 = vmax.f32 %v1037_v40, 0.0  ;;  %v1229_v50 = vmax.f32 %v1150_v48, 0.0 }
 0x1be   : > { %v1041_v15 = vadd.f32 %v1040_v19, %v864_v24  ;;  %v1154_v51 = vadd.f32 %v1153_v49, %v864_v24  ;;  %v1042_v54 = vpop.f32.mrf.mxu0  ;;  %v1155_v26 = vpop.f32.mrf.mxu1 }
 0x1bf   : > { %3567 = vst [vmem:[#allocation6_spill] sm:$0xff] %v3213_v18  ;;  %3568 = vst [vmem:[#allocation7_spill] sm:$0xff] %v3215_v23  ;;  %v3217_v59 = vpack.c.bf16 %v1227_v1, %v1223_v17  ;;  %v3219_v10 = vpack.c.bf16 %v1229_v50, %v1225_v62  ;;  %v1043_v38 = vadd.f32 %v1042_v54, %v864_v24 }
 0x1c0   : > { %v1156_v55 = vadd.f32 %v1155_v26, %v864_v24  ;;  %v1044_v16 = vpop.f32.mrf.mxu0  ;;  %v1157_v63 = vpop.f32.mrf.mxu1  ;;  %v1232_v22 = vmax.f32 %v1154_v51, 0.0  ;;  %v1230_v28 = vmax.f32 %v1041_v15, 0.0 }
 0x1c1   : > { %3569 = vst [vmem:[#allocation8_spill] sm:$0xff] %v3217_v59  ;;  %3570 = vst [vmem:[#allocation9_spill] sm:$0xff] %v3219_v10  ;;  %v1045_v25 = vadd.f32 %v1044_v16, %v869_v0  ;;  %v1158_v27 = vadd.f32 %v1157_v63, %v869_v0  ;;  %v1231_v6 = vmax.f32 %v1043_v38, 0.0 }
 0x1c2   : > { %v1046_v4 = vpop.f32.mrf.mxu0  ;;  %v1159_v5 = vpop.f32.mrf.mxu1  ;;  %v1233_v13 = vmax.f32 %v1156_v55, 0.0 }
 0x1c3   : > { %v1234_v29 = vmax.f32 %v1045_v25, 0.0  ;;  %v1236_v21 = vmax.f32 %v1158_v27, 0.0  ;;  %v1047_v31 = vadd.f32 %v1046_v4, %v869_v0  ;;  %v1160_v57 = vadd.f32 %v1159_v5, %v869_v0 }
 0x1c4   : > { %v3221_v8 = vpop.f32.mrf.mxu0  ;;  %v1163_v14 = vpop.f32.mrf.mxu1 }
 0x1c5   : > { %3571 = vst [vmem:[#allocation10_spill] sm:$0xff] %v3221_v8  ;;  %v3223_v7 = vpack.c.bf16 %v1234_v29, %v1230_v28  ;;  %v3225_v24 = vpack.c.bf16 %v1236_v21, %v1232_v22  ;;  %v1235_v9 = vmax.f32 %v1047_v31, 0.0  ;;  %v1237_v32 = vmax.f32 %v1160_v57, 0.0 }
 0x1c6   : > { %v1052_v43 = vpop.f32.mrf.mxu0  ;;  %v3227_v46 = vpop.f32.mrf.mxu1 }
 0x1c7   : > { %3572 = vst [vmem:[#allocation11_spill] sm:$0xff] %v3223_v7  ;;  %3573 = vst [vmem:[#allocation12_spill] sm:$0xff] %v3225_v24  ;;  %v3229_v44 = vpack.c.bf16 %v1235_v9, %v1231_v6  ;;  %v3231_v30 = vpack.c.bf16 %v1237_v32, %v1233_v13  ;;  %v3256_v13 = vadd.f32 %v1163_v14, %v3209_v41 }
 0x1c8   : > { %3574 = vst [vmem:[#allocation13_spill] sm:$0xff] %v3227_v46  ;;  %v3233_v52 = vpop.f32.mrf.mxu0  ;;  %v3235_v0 = vpop.f32.mrf.mxu1  ;;  %v3259_v9 = vadd.f32 %v1052_v43, %v3209_v41 }
 0x1c9   : > { %3575 = vst [vmem:[#allocation14_spill] sm:$0xff] %v3229_v44  ;;  %3576 = vst [vmem:[#allocation15_spill] sm:$0xff] %v3231_v30 }
 0x1ca   : > { %3577 = vst [vmem:[#allocation16_spill] sm:$0xff] %v3233_v52  ;;  %3578 = vst [vmem:[#allocation17_spill] sm:$0xff] %v3235_v0  ;;  %v1056_v56 = vpop.f32.mrf.mxu0  ;;  %v1169_v45 = vpop.f32.mrf.mxu1 }
 0x1cb   : > { %3580 = vst [vmem:[#allocation19_spill] sm:$0xff] %v3256_v13  ;;  %3581 = vst [vmem:[#allocation20_spill] sm:$0xff] %v3259_v9  ;;  %v3262_v32 = vadd.f32 %v1056_v56, %v3211_v53  ;;  %v3265_v2 = vadd.f32 %v1169_v45, %v3211_v53 }
 0x1cc   : > { %v3237_v58 = vpop.f32.mrf.mxu0  ;;  %v1173_v33 = vpop.f32.mrf.mxu1 }
 0x1cd   : > { %3579 = vst [vmem:[#allocation18_spill] sm:$0xff] %v3237_v58  ;;  %3582 = vst [vmem:[#allocation21_spill] sm:$0xff] %v3262_v32  ;;  %v3268_v23 = vadd.f32 %v1173_v33, %v3205_v20 }
 0x1ce   : > { %v1062_v34 = vpop.f32.mrf.mxu0  ;;  %v3239_v60 = vpop.f32.mrf.mxu1  ;;  %3583 = vst [vmem:[#allocation22_spill] sm:$0xff] %v3265_v2 }
 0x1cf   : > { %3584 = vst [vmem:[#allocation23_spill] sm:$0xff] %v3268_v23  ;;  %v3271_v18 = vadd.f32 %v1062_v34, %v3205_v20 }
 0x1d0   : > { %v3241_v61 = vpop.f32.mrf.mxu0  ;;  %v3243_v40 = vpop.f32.mrf.mxu1 }
 0x1d1   : > { %3585 = vst [vmem:[#allocation24_spill] sm:$0xff] %v3271_v18 }
 0x1d2   : > { %v1066_v48 = vpop.f32.mrf.mxu0  ;;  %v1179_v17 = vpop.f32.mrf.mxu1 }
 0x1d3   : > { %v3274_v14 = vadd.f32 %v1066_v48, %v3207_v47  ;;  %v3277_v43 = vadd.f32 %v1179_v17, %v3207_v47 }
 0x1d4   : > { %v3245_v62 = vpop.f32.mrf.mxu0  ;;  %v1183_v19 = vpop.f32.mrf.mxu1 }
 0x1d5   : > { %v3280_v56 = vadd.f32 %v1183_v19, %v3201_v11 }
 0x1d6   : > { %v1072_v49 = vpop.f32.mrf.mxu0  ;;  %v3247_v1 = vpop.f32.mrf.mxu1 }
 0x1d7   : > { %v3283_v45 = vadd.f32 %v1072_v49, %v3201_v11 }
 0x1d8   : > { %v3249_v50 = vpop.f32.mrf.mxu0  ;;  %v3251_v15 = vpop.f32.mrf.mxu1 }
 0x1da   : > { %v1076_v51 = vpop.f32.mrf.mxu0  ;;  %v1189_v54 = vpop.f32.mrf.mxu1 }
 0x1db   : > { %v3286_v33 = vadd.f32 %v1076_v51, %v3203_v12  ;;  %v3289_v34 = vadd.f32 %v1189_v54, %v3203_v12 }
 0x1dc   : > { %v3253_v26 = vpop.f32.mrf.mxu0  ;;  %v1193_v38 = vpop.f32.mrf.mxu1 }
 0x1dd   : > { %v3292_v24 = vadd.f32 %v1193_v38, %v3197_v37 }
 0x1de   : > { %v1082_v55 = vpop.f32.mrf.mxu0  ;;  %v1195_v16 = vpop.f32.mrf.mxu1 }
 0x1df   : > { %v3295_v48 = vadd.f32 %v1082_v55, %v3197_v37  ;;  %v3298_v19 = vadd.f32 %v1195_v16, %v3197_v37 }
 0x1e0   : > { %v1084_v63 = vpop.f32.mrf.mxu0  ;;  %v1197_v22 = vpop.f32.mrf.mxu1 }
 0x1e1   : > { %v3301_v49 = vadd.f32 %v1084_v63, %v3199_v36  ;;  %v3304_v51 = vadd.f32 %v1197_v22, %v3199_v36 }
 0x1e2   : > { %v1086_v25 = vpop.f32.mrf.mxu0  ;;  %v1199_v27 = vpop.f32.mrf.mxu1 }
 0x1e3   : > { %v3307_v54 = vadd.f32 %v1086_v25, %v3199_v36  ;;  %v3310_v38 = vadd.f32 %v1199_v27, %v3199_v36 }
 0x1e4   : > { %v1090_v28 = vpop.f32.mrf.mxu0  ;;  %v1203_v4 = vpop.f32.mrf.mxu1 }
 0x1e5   : > { %v1204_v55 = vadd.f32 %v1203_v4, %v3195_v35 }
 0x1e6   : > { %v1092_v5 = vpop.f32.mrf.mxu0  ;;  %v1205_v29 = vpop.f32.mrf.mxu1 }
 0x1e7   : > { %v1093_v8 = vadd.f32 %v1092_v5, %v3195_v35  ;;  %v1206_v36 = vadd.f32 %v1205_v29, %v3195_v35 }
 0x1e8   : > { %v1094_v21 = vpop.f32.mrf.mxu0  ;;  %v1207_v31 = vpop.f32.mrf.mxu1 }
 0x1e9   : > { %v1095_v2 = vadd.f32 %v1094_v21, %v3193_v3  ;;  %v1271_v21 = vmax.f32 %v1093_v8, 0.0  ;;  %v1273_v53 = vmax.f32 %v1206_v36, 0.0  ;;  %v1075_v8 = vadd.f32 %v3249_v50, %v3203_v12 }
 0x1ea   : > { %v1096_v57 = vpop.f32.mrf.mxu0  ;;  %v1209_v6 = vpop.f32.mrf.mxu1 }
 0x1eb   : > { %v1097_v30 = vadd.f32 %v1096_v57, %v3193_v3  ;;  %v1210_v44 = vadd.f32 %v1209_v6, %v3193_v3 }
 0x1ec   : > { %v1100_v10 = vpop.f32.mrf.mxu0  ;;  %v1213_v59 = vpop.f32.mrf.mxu1 }
 0x1ed   : > { %v1101_v27 = vadd.f32 %v1100_v10, %v3189_v39  ;;  %v1214_v4 = vadd.f32 %v1213_v59, %v3189_v39  ;;  %v1275_v32 = vmax.f32 %v1097_v30, 0.0  ;;  %v1272_v59 = vmax.f32 %v1204_v55, 0.0 }
 0x1ee   : > { %v1102_v17 = vpop.f32.mrf.mxu0  ;;  %v1215_v7 = vpop.f32.mrf.mxu1 }
 0x1ef   : > { %v1103_v63 = vadd.f32 %v1102_v17, %v3189_v39  ;;  %v1216_v13 = vadd.f32 %v1215_v7, %v3189_v39  ;;  %v1208_v17 = vadd.f32 %v1207_v31, %v3193_v3  ;;  %v1091_v39 = vadd.f32 %v1090_v28, %v3195_v35 }
 0x1f0   : > { %v1104_v16 = vpop.f32.mrf.mxu0  ;;  %v1217_v9 = vpop.f32.mrf.mxu1  ;;  %v1278_v58 = vmax.f32 %v1101_v27, 0.0  ;;  %v1280_v52 = vmax.f32 %v1214_v4, 0.0  ;;  %v1186_v35 = vadd.f32 %v3247_v1, %v3201_v11  ;;  %v1268_v1 = vmax.f32 %v3304_v51, 0.0 }
 0x1f1   : > { %v1105_v22 = vadd.f32 %v1104_v16, %v3191_v42  ;;  %v1218_v25 = vadd.f32 %v1217_v9, %v3191_v42  ;;  %v1277_v9 = vmax.f32 %v1210_v44, 0.0  ;;  %v1279_v23 = vmax.f32 %v1103_v63, 0.0 }
 0x1f2   : > { %v1106_v57 = vpop.f32.mrf.mxu0  ;;  %v1219_v6 = vpop.f32.mrf.mxu1  ;;  %v1281_v29 = vmax.f32 %v1216_v13, 0.0  ;;  %v1276_v46 = vmax.f32 %v1208_v17, 0.0  ;;  %v1267_v44 = vmax.f32 %v3307_v54, 0.0  ;;  %v1269_v63 = vmax.f32 %v3310_v38, 0.0 }
 0x1f3   : > { %v1107_v7 = vadd.f32 %v1106_v57, %v3191_v42  ;;  %v1220_v16 = vadd.f32 %v1219_v6, %v3191_v42  ;;  %v1282_v18 = vmax.f32 %v1105_v22, 0.0  ;;  %v1284_v5 = vmax.f32 %v1218_v25, 0.0  ;;  %v3586_v25 = vld [vmem:[#allocation13_spill] sm:$0xff] }
 0x1f4   : > { %v1274_v57 = vmax.f32 %v1095_v2, 0.0  ;;  %v1343_v13 = vpack.c.bf16 %v1275_v32, %v1271_v21  ;;  %v1345_v22 = vpack.c.bf16 %v1277_v9, %v1273_v53  ;;  %v1081_v2 = vadd.f32 %v3253_v26, %v3197_v37  ;;  %v3590_v6 = vld [vmem:[#allocation17_spill] sm:$0xff] }
 0x1f5   : > { %v1283_v0 = vmax.f32 %v1107_v7, 0.0  ;;  %v1285_v10 = vmax.f32 %v1220_v16, 0.0  ;;  %v1346_v42 = vpack.c.bf16 %v1282_v18, %v1278_v58  ;;  %v1348_v30 = vpack.c.bf16 %v1284_v5, %v1280_v52 }
 0x1f6   : > { %v1188_v18 = vadd.f32 %v3251_v15, %v3203_v12  ;;  %v1264_v52 = vmax.f32 %v3292_v24, 0.0  ;;  %v1263_v53 = vmax.f32 %v3295_v48, 0.0  ;;  %v1266_v58 = vmax.f32 %v3301_v49, 0.0 }
 0x1f7   : > { %v1347_v3 = vpack.c.bf16 %v1283_v0, %v1279_v23  ;;  %v1349_v31 = vpack.c.bf16 %v1285_v10, %v1281_v29  ;;  %v1270_v23 = vmax.f32 %v1091_v39, 0.0  ;;  %v1265_v0 = vmax.f32 %v3298_v19, 0.0 }
 0x1f8   : > { %v1344_v37 = vpack.c.bf16 %v1276_v46, %v1272_v59  ;;  %v1259_v26 = vmax.f32 %v3286_v33, 0.0  ;;  %v1261_v28 = vmax.f32 %v3289_v34, 0.0  ;;  %v1339_v32 = vpack.c.bf16 %v1267_v44, %v1263_v53  ;;  %v3593_v59 = vld [vmem:[#allocation21_spill] sm:$0xff] }
 0x1f9   : > { %1638 = vmatprep.subr.bf16.mxu0 %v1347_v3  ;;  %1831 = vmatprep.subr.bf16.mxu1 %v1349_v31  ;;  %v1342_v50 = vpack.c.bf16 %v1274_v57, %v1270_v23  ;;  %v1341_v12 = vpack.c.bf16 %v1269_v63, %v1265_v0  ;;  %v1176_v24 = vadd.f32 %v3239_v60, %v3205_v20  ;;  %v1262_v19 = vmax.f32 %v1081_v2, 0.0  ;;  %v3596_v63 = vld [vmem:[#allocation19_spill] sm:$0xff] }
 0x1fa   : > { %1639 = vmatpush1.bf16.msra.mxu0 %v1346_v42  ;;  %1832 = vmatpush1.bf16.msra.mxu1 %v1348_v30  ;;  %v1065_v15 = vadd.f32 %v3241_v61, %v3207_v47  ;;  %v1071_v48 = vadd.f32 %v3245_v62, %v3201_v11  ;;  %v1178_v46 = vadd.f32 %v3243_v40, %v3207_v47  ;;  %v1256_v33 = vmax.f32 %v3280_v56, 0.0  ;;  %v3587_v40 = vld [vmem:[#allocation5_spill] sm:$0xff]  ;;  %v3588_v56 = vld [vmem:[#allocation16_spill] sm:$0xff]  ;;  %v3595_v42 = vld [vmem:[#allocation10_spill] sm:$0xff] }
 0x1fb   : > { %1640 = vmatprep.subr.bf16.mxu0 %v1343_v13  ;;  %1833 = vmatprep.subr.bf16.mxu1 %v1345_v22  ;;  %v1255_v34 = vmax.f32 %v3283_v45, 0.0  ;;  %v1257_v49 = vmax.f32 %v1186_v35, 0.0  ;;  %v1258_v60 = vmax.f32 %v1075_v8, 0.0  ;;  %v1260_v51 = vmax.f32 %v1188_v18, 0.0  ;;  %v3589_v45 = vld [vmem:[#allocation18_spill] sm:$0xff]  ;;  %v3597_v22 = vld [vmem:[#allocation20_spill] sm:$0xff] }
 0x1fc   : > { %v1338_v54 = vpack.c.bf16 %v1266_v58, %v1262_v19  ;;  %v1340_v61 = vpack.c.bf16 %v1268_v1, %v1264_v52  ;;  %v1251_v38 = vmax.f32 %v3274_v14, 0.0  ;;  %v1253_v11 = vmax.f32 %v3277_v43, 0.0  ;;  %v3591_v14 = vld [vmem:[#allocation23_spill] sm:$0xff]  ;;  %v3592_v43 = vld [vmem:[#allocation24_spill] sm:$0xff] }
 0x1fd   : > { %v1335_v62 = vpack.c.bf16 %v1259_v26, %v1255_v34  ;;  %v1337_v55 = vpack.c.bf16 %v1261_v28, %v1257_v49  ;;  %v1166_v47 = vadd.f32 %v3586_v25, %v3209_v41  ;;  %v1055_v36 = vadd.f32 %v3588_v56, %v3587_v40  ;;  %v3600_v26 = vld [vmem:[#allocation11_spill] sm:$0xff]  ;;  %v3601_v28 = vld [vmem:[#allocation12_spill] sm:$0xff]  ;;  %v2490_v49 = vld [vmem:[%s3557_s5 + $0x20] sm:$0xff]  }
 0x1fe   : > { %1641 = vmatpush1.bf16.msra.mxu0 %v1342_v50  ;;  %1834 = vmatpush1.bf16.msra.mxu1 %v1344_v37  ;;  %v1061_v27 = vadd.f32 %v3589_v45, %v3205_v20  ;;  %v1254_v4 = vmax.f32 %v1071_v48, 0.0  ;;  %v1168_v17 = vadd.f32 %v3590_v6, %v3587_v40  ;;  %v1248_v7 = vmax.f32 %v3591_v14, 0.0  ;;  %v3594_v20 = vld [vmem:[#allocation22_spill] sm:$0xff]  ;;  %v3599_v37 = vld [vmem:[#allocation15_spill] sm:$0xff]  ;;  %v2489_v34 = vld [vmem:[%s3557_s5 + $0x18] sm:$0xff]   ;;  %v1385_v45 = vpop.permute.xlu1 %1384 }
 0x1ff   : > { %1642 = vmatprep.subr.bf16.mxu0 %v1339_v32  ;;  %1835 = vmatprep.subr.bf16.mxu1 %v1341_v12  ;;  %v1247_v16 = vmax.f32 %v3592_v43, 0.0  ;;  %v1249_v9 = vmax.f32 %v1176_v24, 0.0  ;;  %v1250_v5 = vmax.f32 %v1065_v15, 0.0  ;;  %v1252_v29 = vmax.f32 %v1178_v46, 0.0  ;;  %v3598_v50 = vld [vmem:[#allocation14_spill] sm:$0xff]  ;;  %v3602_v32 = vld [vmem:[#allocation8_spill] sm:$0xff]  ;;  %v1390_v43 = vpop.permute.xlu0 %1389 }
 0x200   : > { %v1334_v10 = vpack.c.bf16 %v1258_v60, %v1254_v4  ;;  %v1336_v39 = vpack.c.bf16 %v1260_v51, %v1256_v33  ;;  %v1243_v21 = vmax.f32 %v3593_v59, 0.0  ;;  %v1245_v3 = vmax.f32 %v3594_v20, 0.0  ;;  %v3603_v12 = vld [vmem:[#allocation9_spill] sm:$0xff]  ;;  %v3604_v15 = vld [vmem:[#allocation6_spill] sm:$0xff]  ;;  %v3605_v48 = vld [vmem:[#allocation7_spill] sm:$0xff] }
 0x201   : > { %v1331_v31 = vpack.c.bf16 %v1251_v38, %v1247_v16  ;;  %v1333_v57 = vpack.c.bf16 %v1253_v11, %v1249_v9  ;;  %v1051_v30 = vadd.f32 %v3595_v42, %v3209_v41  ;;  %v1246_v44 = vmax.f32 %v1061_v27, 0.0  ;;  %v2486_v24 = vld [vmem:[%s3557_s5] sm:$0xff]   ;;  %v2487_v46 = vld [vmem:[%s3557_s5 + $0x8] sm:$0xff]   ;;  %v2488_v33 = vld [vmem:[%s3557_s5 + $0x10] sm:$0xff]  }
 0x202   : > { %1643 = vmatpush1.bf16.msra.mxu0 %v1338_v54  ;;  %1836 = vmatpush1.bf16.msra.mxu1 %v1340_v61  ;;  %v1240_v13 = vmax.f32 %v3596_v63, 0.0  ;;  %v1239_v35 = vmax.f32 %v3597_v22, 0.0  ;;  %v1241_v8 = vmax.f32 %v1166_v47, 0.0  ;;  %v1242_v2 = vmax.f32 %v1055_v36, 0.0  ;;  %v2491_v60 = vld [vmem:[%s3557_s5 + $0x28] sm:$0xff]   ;;  %v2492_v51 = vld [vmem:[%s3557_s5 + $0x30] sm:$0xff]  }
 0x203   : > { %1644 = vmatprep.subr.bf16.mxu0 %v1335_v62  ;;  %1837 = vmatprep.subr.bf16.mxu1 %v1337_v55  ;;  %v1244_v23 = vmax.f32 %v1168_v17, 0.0  ;;  %v1330_v18 = vpack.c.bf16 %v1250_v5, %v1246_v44  ;;  %v1332_v52 = vpack.c.bf16 %v1252_v29, %v1248_v7  ;;  %v1238_v58 = vmax.f32 %v1051_v30, 0.0  ;;  %v2493_v54 = vld [vmem:[%s3557_s5 + $0x38] sm:$0xff]   ;;  %v2494_v61 = vld [vmem:[%s3557_s5 + $0x40] sm:$0xff]   ;;  %v2495_v38 = vld [vmem:[%s3557_s5 + $0x48] sm:$0xff]  }
 0x204   : > { %v1327_v53 = vpack.c.bf16 %v1243_v21, %v1239_v35  ;;  %v1329_v0 = vpack.c.bf16 %v1245_v3, %v1241_v8  ;;  %v3606_v19 = vmov 0   ;;  %v2496_v11 = vld [vmem:[%s3557_s5 + $0x50] sm:$0xff]   ;;  %v2497_v62 = vld [vmem:[%s3557_s5 + $0x58] sm:$0xff]   ;;  %v2498_v55 = vld [vmem:[%s3557_s5 + $0x60] sm:$0xff]  }
 0x205   : > { %v1326_v41 = vpack.c.bf16 %v1242_v2, %v1238_v58  ;;  %v1328_v1 = vpack.c.bf16 %v1244_v23, %v1240_v13  ;;  %v2499_v25 = vld [vmem:[%s3557_s5 + $0x68] sm:$0xff]   ;;  %v2500_v47 = vld [vmem:[%s3557_s5 + $0x70] sm:$0xff]   ;;  %v2501_v40 = vld [vmem:[%s3557_s5 + $0x78] sm:$0xff]  }
 0x206   : > { %1645 = vmatpush1.bf16.msra.mxu0 %v1334_v10  ;;  %1838 = vmatpush1.bf16.msra.mxu1 %v1336_v39 }
 0x207   : > { %1646 = vmatprep.subr.bf16.mxu0 %v1331_v31  ;;  %1839 = vmatprep.subr.bf16.mxu1 %v1333_v57  ;;  %v1395_v31 = vpop.permute.xlu1 %1394 }
 0x20a   : > { %1647 = vmatpush1.bf16.msra.mxu0 %v1330_v18  ;;  %1840 = vmatpush1.bf16.msra.mxu1 %v1332_v52  ;;  %v1400_v18 = vpop.permute.xlu0 %1399 }
 0x20b   : > { %1648 = vmatprep.subr.bf16.mxu0 %v1327_v53  ;;  %1841 = vmatprep.subr.bf16.mxu1 %v1329_v0 }
 0x20e   : > { %1649 = vmatpush1.bf16.msra.mxu0 %v1326_v41  ;;  %1842 = vmatpush1.bf16.msra.mxu1 %v1328_v1 }
 0x20f   : > { %1650 = vmatprep.subr.bf16.mxu0 %v3598_v50  ;;  %1843 = vmatprep.subr.bf16.mxu1 %v3599_v37 }
 0x212   : > { %1651 = vmatpush1.bf16.msra.mxu0 %v3600_v26  ;;  %1844 = vmatpush1.bf16.msra.mxu1 %v3601_v28 }
 0x213   : > { %1652 = vmatprep.subr.bf16.mxu0 %v3602_v32  ;;  %1845 = vmatprep.subr.bf16.mxu1 %v3603_v12  ;;  %v1405_v12 = vpop.permute.xlu1 %1404 }
 0x216   : > { %1653 = vmatpush1.bf16.msra.mxu0 %v3604_v15  ;;  %1846 = vmatpush1.bf16.msra.mxu1 %v3605_v48 }
 0x219   : > { %1671 = vmatmul.mubr.bf16.vlgmr.msra.gmra.mxu0 %v2486_v24  ;;  %1864 = vmatmul.mubr.bf16.vlgmr.msra.gmra.mxu1 %v2486_v24 }
 0x21a   : > { %1680 = vmatprep.mubr.bf16.mxu0 %v3606_v19  ;;  %1873 = vmatprep.mubr.bf16.mxu1 %v3606_v19 }
 0x221   : > { %1681 = vmatmul.mubr.bf16.gmra.mxu0 %v2487_v46  ;;  %1874 = vmatmul.mubr.bf16.gmra.mxu1 %v2487_v46 }
 0x222   : > { %1690 = vmatprep.mubr.bf16.mxu0 %v3606_v19  ;;  %1883 = vmatprep.mubr.bf16.mxu1 %v3606_v19 }
 0x229   : > { %1691 = vmatmul.mubr.bf16.gmra.mxu0 %v2488_v33  ;;  %1884 = vmatmul.mubr.bf16.gmra.mxu1 %v2488_v33 }
 0x22a   : > { %1700 = vmatprep.mubr.bf16.mxu0 %v3606_v19  ;;  %1893 = vmatprep.mubr.bf16.mxu1 %v3606_v19 }
 0x231   : > { %1701 = vmatmul.mubr.bf16.gmra.mxu0 %v2489_v34  ;;  %1894 = vmatmul.mubr.bf16.gmra.mxu1 %v2489_v34 }
 0x232   : > { %1710 = vmatprep.mubr.bf16.mxu0 %v3606_v19  ;;  %1903 = vmatprep.mubr.bf16.mxu1 %v3606_v19 }
 0x239   : > { %1711 = vmatmul.mubr.bf16.gmra.mxu0 %v2490_v49  ;;  %1904 = vmatmul.mubr.bf16.gmra.mxu1 %v2490_v49 }
 0x23a   : > { %1720 = vmatprep.mubr.bf16.mxu0 %v3606_v19  ;;  %1913 = vmatprep.mubr.bf16.mxu1 %v3606_v19 }
 0x241   : > { %1721 = vmatmul.mubr.bf16.gmra.mxu0 %v2491_v60  ;;  %1914 = vmatmul.mubr.bf16.gmra.mxu1 %v2491_v60 }
 0x242   : > { %1730 = vmatprep.mubr.bf16.mxu0 %v3606_v19  ;;  %1923 = vmatprep.mubr.bf16.mxu1 %v3606_v19 }
 0x249   : > { %1731 = vmatmul.mubr.bf16.gmra.mxu0 %v2492_v51  ;;  %1924 = vmatmul.mubr.bf16.gmra.mxu1 %v2492_v51 }
 0x24a   : > { %1740 = vmatprep.mubr.bf16.mxu0 %v3606_v19  ;;  %1933 = vmatprep.mubr.bf16.mxu1 %v3606_v19 }
 0x251   : > { %1741 = vmatmul.mubr.bf16.gmra.mxu0 %v2493_v54  ;;  %1934 = vmatmul.mubr.bf16.gmra.mxu1 %v2493_v54 }
 0x252   : > { %1750 = vmatprep.mubr.bf16.mxu0 %v3606_v19  ;;  %1943 = vmatprep.mubr.bf16.mxu1 %v3606_v19 }
 0x259   : > { %1751 = vmatmul.mubr.bf16.gmra.mxu0 %v2494_v61  ;;  %1944 = vmatmul.mubr.bf16.gmra.mxu1 %v2494_v61  ;;  %v1410_v61 = vpop.permute.xlu0 %1409 }
 0x25a   : > { %1760 = vmatprep.mubr.bf16.mxu0 %v3606_v19  ;;  %1953 = vmatprep.mubr.bf16.mxu1 %v3606_v19 }
 0x261   : > { %1761 = vmatmul.mubr.bf16.gmra.mxu0 %v2495_v38  ;;  %1954 = vmatmul.mubr.bf16.gmra.mxu1 %v2495_v38 }
 0x262   : > { %1770 = vmatprep.mubr.bf16.mxu0 %v3606_v19  ;;  %1963 = vmatprep.mubr.bf16.mxu1 %v3606_v19 }
 0x269   : > { %1771 = vmatmul.mubr.bf16.gmra.mxu0 %v2496_v11  ;;  %1964 = vmatmul.mubr.bf16.gmra.mxu1 %v2496_v11 }
 0x26a   : > { %1780 = vmatprep.mubr.bf16.mxu0 %v3606_v19  ;;  %1973 = vmatprep.mubr.bf16.mxu1 %v3606_v19 }
 0x271   : > { %1781 = vmatmul.mubr.bf16.gmra.mxu0 %v2497_v62  ;;  %1974 = vmatmul.mubr.bf16.gmra.mxu1 %v2497_v62 }
 0x272   : > { %1790 = vmatprep.mubr.bf16.mxu0 %v3606_v19  ;;  %1983 = vmatprep.mubr.bf16.mxu1 %v3606_v19 }
 0x279   : > { %1791 = vmatmul.mubr.bf16.gmra.mxu0 %v2498_v55  ;;  %1984 = vmatmul.mubr.bf16.gmra.mxu1 %v2498_v55 }
 0x27a   : > { %1800 = vmatprep.mubr.bf16.mxu0 %v3606_v19  ;;  %1993 = vmatprep.mubr.bf16.mxu1 %v3606_v19 }
 0x281   : > { %1801 = vmatmul.mubr.bf16.gmra.mxu0 %v2499_v25  ;;  %1994 = vmatmul.mubr.bf16.gmra.mxu1 %v2499_v25 }
 0x282   : > { %1810 = vmatprep.mubr.bf16.mxu0 %v3606_v19  ;;  %2003 = vmatprep.mubr.bf16.mxu1 %v3606_v19 }
 0x289   : > { %1811 = vmatmul.mubr.bf16.gmra.mxu0 %v2500_v47  ;;  %2004 = vmatmul.mubr.bf16.gmra.mxu1 %v2500_v47 }
 0x28a   : > { %1820 = vmatprep.mubr.bf16.mxu0 %v3606_v19  ;;  %2013 = vmatprep.mubr.bf16.mxu1 %v3606_v19 }
 0x291   : > { %1821 = vmatmul.mubr.bf16.gmra.mxu0 %v2501_v40  ;;  %2014 = vmatmul.mubr.bf16.gmra.mxu1 %v2501_v40 }
 0x2d9   : > { %v1672_v56 = vpop.f32.mrf.mxu0  ;;  %v1865_v36 = vpop.f32.mrf.mxu1 }
 0x2da   : > { %v1673_v6 = vadd.f32 %v1672_v56, %v1385_v45  ;;  %v1866_v16 = vadd.f32 %v1865_v36, %v1385_v45 }
 0x2db   : > { %v1674_v27 = vpop.f32.mrf.mxu0  ;;  %v1867_v4 = vpop.f32.mrf.mxu1 }
 0x2dc   : > { %v1675_v17 = vadd.f32 %v1674_v27, %v1385_v45  ;;  %v1868_v10 = vadd.f32 %v1867_v4, %v1385_v45  ;;  %v1415_v4 = vpop.permute.xlu1 %1414 }
 0x2dd   : > { %v1676_v14 = vpop.f32.mrf.mxu0  ;;  %v1869_v7 = vpop.f32.mrf.mxu1 }
 0x2de   : > { %v2024_v9 = vmax.f32 %v1673_v6, %v1675_v17  ;;  %v1677_v59 = vadd.f32 %v1676_v14, %v1390_v43  ;;  %v1870_v42 = vadd.f32 %v1869_v7, %v1390_v43 }
 0x2df   : > { %v1678_v5 = vpop.f32.mrf.mxu0  ;;  %v1871_v29 = vpop.f32.mrf.mxu1 }
 0x2e0   : > { %v2056_v39 = vmax.f32 %v2024_v9, %v1866_v16  ;;  %v1679_v21 = vadd.f32 %v1678_v5, %v1390_v43  ;;  %v1872_v44 = vadd.f32 %v1871_v29, %v1390_v43 }
 0x2e1   : > { %v1682_v20 = vpop.f32.mrf.mxu0  ;;  %v1875_v3 = vpop.f32.mrf.mxu1 }
 0x2e2   : > { %v2088_v57 = vmax.f32 %v2056_v39, %v1868_v10  ;;  %v2025_v30 = vmax.f32 %v1677_v59, %v1679_v21  ;;  %v1683_v35 = vadd.f32 %v1682_v20, %v1395_v31  ;;  %v1876_v53 = vadd.f32 %v1875_v3, %v1395_v31  ;;  %v1420_v59 = vpop.permute.xlu0 %1419 }
 0x2e3   : > { %v1684_v63 = vpop.f32.mrf.mxu0  ;;  %v1877_v13 = vpop.f32.mrf.mxu1 }
 0x2e4   : > { %v2057_v22 = vmax.f32 %v2025_v30, %v1870_v42  ;;  %v1685_v8 = vadd.f32 %v1684_v63, %v1395_v31  ;;  %2220 = vst [vmem:[%s3462_s16] sm:$0xff] %v2088_v57  ;;  %v1878_v58 = vadd.f32 %v1877_v13, %v1395_v31 }
 0x2e5   : > { %v1686_v2 = vpop.f32.mrf.mxu0  ;;  %v1879_v23 = vpop.f32.mrf.mxu1 }
 0x2e6   : > { %v2089_v52 = vmax.f32 %v2057_v22, %v1872_v44  ;;  %v2026_v0 = vmax.f32 %v1683_v35, %v1685_v8  ;;  %v1687_v37 = vadd.f32 %v1686_v2, %v1400_v18  ;;  %v1880_v15 = vadd.f32 %v1879_v23, %v1400_v18  ;;  %v1425_v35 = vpop.permute.xlu1 %1424 }
 0x2e7   : > { %v1688_v41 = vpop.f32.mrf.mxu0  ;;  %v1881_v1 = vpop.f32.mrf.mxu1 }
 0x2e8   : > { %v2058_v50 = vmax.f32 %v2026_v0, %v1876_v53  ;;  %v1689_v26 = vadd.f32 %v1688_v41, %v1400_v18  ;;  %2221 = vst [vmem:[%s3462_s16 + $0x8] sm:$0xff] %v2089_v52  ;;  %v1882_v19 = vadd.f32 %v1881_v1, %v1400_v18 }
 0x2e9   : > { %v1692_v28 = vpop.f32.mrf.mxu0  ;;  %v1885_v32 = vpop.f32.mrf.mxu1 }
 0x2ea   : > { %v2090_v24 = vmax.f32 %v2058_v50, %v1878_v58  ;;  %v2027_v48 = vmax.f32 %v1687_v37, %v1689_v26  ;;  %v1693_v49 = vadd.f32 %v1692_v28, %v1405_v12  ;;  %v1886_v11 = vadd.f32 %v1885_v32, %v1405_v12  ;;  %v1430_v37 = vpop.permute.xlu0 %1429 }
 0x2eb   : > { %v1694_v46 = vpop.f32.mrf.mxu0  ;;  %v1887_v33 = vpop.f32.mrf.mxu1 }
 0x2ec   : > { %v2059_v34 = vmax.f32 %v2027_v48, %v1880_v15  ;;  %v1695_v60 = vadd.f32 %v1694_v46, %v1405_v12  ;;  %2222 = vst [vmem:[%s3462_s16 + $0x10] sm:$0xff] %v2090_v24  ;;  %v1888_v55 = vadd.f32 %v1887_v33, %v1405_v12 }
 0x2ed   : > { %v1696_v51 = vpop.f32.mrf.mxu0  ;;  %v1889_v54 = vpop.f32.mrf.mxu1 }
 0x2ee   : > { %v2091_v38 = vmax.f32 %v2059_v34, %v1882_v19  ;;  %v2028_v62 = vmax.f32 %v1693_v49, %v1695_v60  ;;  %v1697_v56 = vadd.f32 %v1696_v51, %v1410_v61  ;;  %v1890_v17 = vadd.f32 %v1889_v54, %v1410_v61  ;;  %v1435_v49 = vpop.permute.xlu1 %1434 }
 0x2ef   : > { %v1698_v25 = vpop.f32.mrf.mxu0  ;;  %v1891_v47 = vpop.f32.mrf.mxu1 }
 0x2f0   : > { %v2060_v40 = vmax.f32 %v2028_v62, %v1886_v11  ;;  %v1699_v36 = vadd.f32 %v1698_v25, %v1410_v61  ;;  %2223 = vst [vmem:[%s3462_s16 + $0x18] sm:$0xff] %v2091_v38  ;;  %v1892_v7 = vadd.f32 %v1891_v47, %v1410_v61 }
 0x2f1   : > { %v1702_v45 = vpop.f32.mrf.mxu0  ;;  %v1895_v27 = vpop.f32.mrf.mxu1 }
 0x2f2   : > { %v2092_v6 = vmax.f32 %v2060_v40, %v1888_v55  ;;  %v2029_v14 = vmax.f32 %v1697_v56, %v1699_v36  ;;  %v1703_v5 = vadd.f32 %v1702_v45, %v1415_v4  ;;  %v1896_v20 = vadd.f32 %v1895_v27, %v1415_v4  ;;  %v1440_v56 = vpop.permute.xlu0 %1439 }
 0x2f3   : > { %v1704_v43 = vpop.f32.mrf.mxu0  ;;  %v1897_v16 = vpop.f32.mrf.mxu1 }
 0x2f4   : > { %v2061_v9 = vmax.f32 %v2029_v14, %v1890_v17  ;;  %v1705_v29 = vadd.f32 %v1704_v43, %v1415_v4  ;;  %2224 = vst [vmem:[%s3462_s16 + $0x20] sm:$0xff] %v2092_v6  ;;  %v1898_v31 = vadd.f32 %v1897_v16, %v1415_v4 }
 0x2f5   : > { %v1706_v10 = vpop.f32.mrf.mxu0  ;;  %v1899_v39 = vpop.f32.mrf.mxu1 }
 0x2f6   : > { %v2093_v21 = vmax.f32 %v2061_v9, %v1892_v7  ;;  %v2030_v3 = vmax.f32 %v1703_v5, %v1705_v29  ;;  %v1707_v44 = vadd.f32 %v1706_v10, %v1420_v59  ;;  %v1900_v2 = vadd.f32 %v1899_v39, %v1420_v59  ;;  %v1445_v5 = vpop.permute.xlu1 %1444 }
 0x2f7   : > { %v1708_v57 = vpop.f32.mrf.mxu0  ;;  %v1901_v42 = vpop.f32.mrf.mxu1 }
 0x2f8   : > { %v2062_v30 = vmax.f32 %v2030_v3, %v1896_v20  ;;  %v1709_v63 = vadd.f32 %v1708_v57, %v1420_v59  ;;  %2225 = vst [vmem:[%s3462_s16 + $0x28] sm:$0xff] %v2093_v21  ;;  %v1902_v18 = vadd.f32 %v1901_v42, %v1420_v59 }
 0x2f9   : > { %v1712_v13 = vpop.f32.mrf.mxu0  ;;  %v1905_v22 = vpop.f32.mrf.mxu1 }
 0x2fa   : > { %v2094_v8 = vmax.f32 %v2062_v30, %v1898_v31  ;;  %v2031_v23 = vmax.f32 %v1707_v44, %v1709_v63  ;;  %v1713_v58 = vadd.f32 %v1712_v13, %v1425_v35  ;;  %v1906_v28 = vadd.f32 %v1905_v22, %v1425_v35  ;;  %v1450_v44 = vpop.permute.xlu0 %1449 }
 0x2fb   : > { %v1714_v52 = vpop.f32.mrf.mxu0  ;;  %v1907_v53 = vpop.f32.mrf.mxu1 }
 0x2fc   : > { %v2063_v0 = vmax.f32 %v2031_v23, %v1900_v2  ;;  %v1715_v41 = vadd.f32 %v1714_v52, %v1425_v35  ;;  %2226 = vst [vmem:[%s3462_s16 + $0x30] sm:$0xff] %v2094_v8  ;;  %v1908_v12 = vadd.f32 %v1907_v53, %v1425_v35 }
 0x2fd   : > { %v1716_v1 = vpop.f32.mrf.mxu0  ;;  %v1909_v50 = vpop.f32.mrf.mxu1 }
 0x2fe   : > { %v2095_v26 = vmax.f32 %v2063_v0, %v1902_v18  ;;  %v2032_v32 = vmax.f32 %v1713_v58, %v1715_v41  ;;  %v1717_v19 = vadd.f32 %v1716_v1, %v1430_v37  ;;  %v1910_v51 = vadd.f32 %v1909_v50, %v1430_v37  ;;  %v1455_v58 = vpop.permute.xlu1 %1454 }
 0x2ff   : > { %v1718_v24 = vpop.f32.mrf.mxu0  ;;  %v1911_v15 = vpop.f32.mrf.mxu1 }
 0x300   : > { %v2064_v48 = vmax.f32 %v2032_v32, %v1906_v28  ;;  %v1719_v46 = vadd.f32 %v1718_v24, %v1430_v37  ;;  %2227 = vst [vmem:[%s3462_s16 + $0x38] sm:$0xff] %v2095_v26  ;;  %v1912_v61 = vadd.f32 %v1911_v15, %v1430_v37 }
 0x301   : > { %v1722_v33 = vpop.f32.mrf.mxu0  ;;  %v1915_v34 = vpop.f32.mrf.mxu1 }
 0x302   : > { %v2096_v60 = vmax.f32 %v2064_v48, %v1908_v12  ;;  %v2033_v54 = vmax.f32 %v1717_v19, %v1719_v46  ;;  %v1723_v55 = vadd.f32 %v1722_v33, %v1435_v49  ;;  %v1916_v45 = vadd.f32 %v1915_v34, %v1435_v49  ;;  %v1460_v19 = vpop.permute.xlu0 %1459 }
 0x303   : > { %v1724_v38 = vpop.f32.mrf.mxu0  ;;  %v1917_v11 = vpop.f32.mrf.mxu1 }
 0x304   : > { %v2065_v62 = vmax.f32 %v2033_v54, %v1910_v51  ;;  %v1725_v25 = vadd.f32 %v1724_v38, %v1435_v49  ;;  %2228 = vst [vmem:[%s3462_s16 + $0x40] sm:$0xff] %v2096_v60  ;;  %v1918_v4 = vadd.f32 %v1917_v11, %v1435_v49 }
 0x305   : > { %v1726_v47 = vpop.f32.mrf.mxu0  ;;  %v1919_v40 = vpop.f32.mrf.mxu1 }
 0x306   : > { %v2097_v36 = vmax.f32 %v2065_v62, %v1912_v61  ;;  %v2034_v27 = vmax.f32 %v1723_v55, %v1725_v25  ;;  %v1727_v7 = vadd.f32 %v1726_v47, %v1440_v56  ;;  %v1920_v10 = vadd.f32 %v1919_v40, %v1440_v56  ;;  %v1465_v55 = vpop.permute.xlu1 %1464 }
 0x307   : > { %v1728_v6 = vpop.f32.mrf.mxu0  ;;  %v1921_v17 = vpop.f32.mrf.mxu1 }
 0x308   : > { %v2066_v14 = vmax.f32 %v2034_v27, %v1916_v45  ;;  %v1729_v43 = vadd.f32 %v1728_v6, %v1440_v56  ;;  %2229 = vst [vmem:[%s3462_s16 + $0x48] sm:$0xff] %v2097_v36  ;;  %v1922_v59 = vadd.f32 %v1921_v17, %v1440_v56 }
 0x309   : > { %v1732_v16 = vpop.f32.mrf.mxu0  ;;  %v1925_v9 = vpop.f32.mrf.mxu1 }
 0x30a   : > { %v2098_v29 = vmax.f32 %v2066_v14, %v1918_v4  ;;  %v2035_v39 = vmax.f32 %v1727_v7, %v1729_v43  ;;  %v1733_v31 = vadd.f32 %v1732_v16, %v1445_v5  ;;  %v1926_v13 = vadd.f32 %v1925_v9, %v1445_v5  ;;  %v1470_v7 = vpop.permute.xlu0 %1469 }
 0x30b   : > { %v1734_v21 = vpop.f32.mrf.mxu0  ;;  %v1927_v20 = vpop.f32.mrf.mxu1 }
 0x30c   : > { %v2067_v3 = vmax.f32 %v2035_v39, %v1920_v10  ;;  %v1735_v57 = vadd.f32 %v1734_v21, %v1445_v5  ;;  %2230 = vst [vmem:[%s3462_s16 + $0x50] sm:$0xff] %v2098_v29  ;;  %v1928_v35 = vadd.f32 %v1927_v20, %v1445_v5 }
 0x30d   : > { %v1736_v42 = vpop.f32.mrf.mxu0  ;;  %v1929_v30 = vpop.f32.mrf.mxu1 }
 0x30e   : > { %v2099_v63 = vmax.f32 %v2067_v3, %v1922_v59  ;;  %v2036_v22 = vmax.f32 %v1733_v31, %v1735_v57  ;;  %v1737_v18 = vadd.f32 %v1736_v42, %v1450_v44  ;;  %v1930_v1 = vadd.f32 %v1929_v30, %v1450_v44  ;;  %v1475_v31 = vpop.permute.xlu1 %1474 }
 0x30f   : > { %v1738_v8 = vpop.f32.mrf.mxu0  ;;  %v1931_v2 = vpop.f32.mrf.mxu1 }
 0x310   : > { %v2068_v23 = vmax.f32 %v2036_v22, %v1926_v13  ;;  %v1739_v52 = vadd.f32 %v1738_v8, %v1450_v44  ;;  %2231 = vst [vmem:[%s3462_s16 + $0x58] sm:$0xff] %v2099_v63  ;;  %v1932_v37 = vadd.f32 %v1931_v2, %v1450_v44 }
 0x311   : > { %v1742_v53 = vpop.f32.mrf.mxu0  ;;  %v1935_v0 = vpop.f32.mrf.mxu1 }
 0x312   : > { %v2100_v41 = vmax.f32 %v2068_v23, %v1928_v35  ;;  %v2037_v50 = vmax.f32 %v1737_v18, %v1739_v52  ;;  %v1743_v12 = vadd.f32 %v1742_v53, %v1455_v58  ;;  %v1936_v33 = vadd.f32 %v1935_v0, %v1455_v58  ;;  %v1480_v18 = vpop.permute.xlu0 %1479 }
 0x313   : > { %v1744_v26 = vpop.f32.mrf.mxu0  ;;  %v1937_v28 = vpop.f32.mrf.mxu1 }
 0x314   : > { %v2069_v32 = vmax.f32 %v2037_v50, %v1930_v1  ;;  %v1745_v24 = vadd.f32 %v1744_v26, %v1455_v58  ;;  %2232 = vst [vmem:[%s3462_s16 + $0x60] sm:$0xff] %v2100_v41  ;;  %v1938_v49 = vadd.f32 %v1937_v28, %v1455_v58 }
 0x315   : > { %v1746_v15 = vpop.f32.mrf.mxu0  ;;  %v1939_v48 = vpop.f32.mrf.mxu1 }
 0x316   : > { %v2101_v46 = vmax.f32 %v2069_v32, %v1932_v37  ;;  %v2038_v34 = vmax.f32 %v1743_v12, %v1745_v24  ;;  %v1747_v61 = vadd.f32 %v1746_v15, %v1460_v19  ;;  %v1940_v47 = vadd.f32 %v1939_v48, %v1460_v19  ;;  %v1485_v12 = vpop.permute.xlu1 %1484 }
 0x317   : > { %v1748_v60 = vpop.f32.mrf.mxu0  ;;  %v1941_v51 = vpop.f32.mrf.mxu1 }
 0x318   : > { %v2070_v54 = vmax.f32 %v2038_v34, %v1936_v33  ;;  %v1749_v38 = vadd.f32 %v1748_v60, %v1460_v19  ;;  %2233 = vst [vmem:[%s3462_s16 + $0x68] sm:$0xff] %v2101_v46  ;;  %v1942_v56 = vadd.f32 %v1941_v51, %v1460_v19 }
 0x319   : > { %v1752_v11 = vpop.f32.mrf.mxu0  ;;  %v1945_v62 = vpop.f32.mrf.mxu1 }
 0x31a   : > { %v2102_v25 = vmax.f32 %v2070_v54, %v1938_v49  ;;  %v2039_v40 = vmax.f32 %v1747_v61, %v1749_v38  ;;  %v1753_v4 = vadd.f32 %v1752_v11, %v1465_v55  ;;  %v1946_v16 = vadd.f32 %v1945_v62, %v1465_v55  ;;  %v1490_v61 = vpop.permute.xlu0 %1489 }
 0x31b   : > { %v1754_v36 = vpop.f32.mrf.mxu0  ;;  %v1947_v45 = vpop.f32.mrf.mxu1 }
 0x31c   : > { %v2071_v27 = vmax.f32 %v2039_v40, %v1940_v47  ;;  %v1755_v6 = vadd.f32 %v1754_v36, %v1465_v55  ;;  %2234 = vst [vmem:[%s3462_s16 + $0x70] sm:$0xff] %v2102_v25  ;;  %v1948_v5 = vadd.f32 %v1947_v45, %v1465_v55 }
 0x31d   : > { %v1756_v17 = vpop.f32.mrf.mxu0  ;;  %v1949_v14 = vpop.f32.mrf.mxu1 }
 0x31e   : > { %v2103_v43 = vmax.f32 %v2071_v27, %v1942_v56  ;;  %v2040_v9 = vmax.f32 %v1753_v4, %v1755_v6  ;;  %v1757_v59 = vadd.f32 %v1756_v17, %v1470_v7  ;;  %v1950_v42 = vadd.f32 %v1949_v14, %v1470_v7  ;;  %v1495_v4 = vpop.permute.xlu1 %1494 }
 0x31f   : > { %v1758_v29 = vpop.f32.mrf.mxu0  ;;  %v1951_v10 = vpop.f32.mrf.mxu1 }
 0x320   : > { %v2072_v39 = vmax.f32 %v2040_v9, %v1946_v16  ;;  %v1759_v21 = vadd.f32 %v1758_v29, %v1470_v7  ;;  %2235 = vst [vmem:[%s3462_s16 + $0x78] sm:$0xff] %v2103_v43  ;;  %v1952_v44 = vadd.f32 %v1951_v10, %v1470_v7 }
 0x321   : > { %v1762_v20 = vpop.f32.mrf.mxu0  ;;  %v1955_v3 = vpop.f32.mrf.mxu1 }
 0x322   : > { %v2104_v57 = vmax.f32 %v2072_v39, %v1948_v5  ;;  %v2041_v30 = vmax.f32 %v1757_v59, %v1759_v21  ;;  %v1763_v35 = vadd.f32 %v1762_v20, %v1475_v31  ;;  %v1956_v53 = vadd.f32 %v1955_v3, %v1475_v31  ;;  %v1500_v59 = vpop.permute.xlu0 %1499 }
 0x323   : > { %v1764_v63 = vpop.f32.mrf.mxu0  ;;  %v1957_v13 = vpop.f32.mrf.mxu1 }
 0x324   : > { %v2073_v22 = vmax.f32 %v2041_v30, %v1950_v42  ;;  %v1765_v8 = vadd.f32 %v1764_v63, %v1475_v31  ;;  %2236 = vst [vmem:[%s3462_s16 + $0x80] sm:$0xff] %v2104_v57  ;;  %v1958_v58 = vadd.f32 %v1957_v13, %v1475_v31 }
 0x325   : > { %v1766_v2 = vpop.f32.mrf.mxu0  ;;  %v1959_v23 = vpop.f32.mrf.mxu1 }
 0x326   : > { %v2105_v52 = vmax.f32 %v2073_v22, %v1952_v44  ;;  %v2042_v0 = vmax.f32 %v1763_v35, %v1765_v8  ;;  %v1767_v37 = vadd.f32 %v1766_v2, %v1480_v18  ;;  %v1960_v15 = vadd.f32 %v1959_v23, %v1480_v18  ;;  %v1505_v35 = vpop.permute.xlu1 %1504 }
 0x327   : > { %v1768_v41 = vpop.f32.mrf.mxu0  ;;  %v1961_v1 = vpop.f32.mrf.mxu1 }
 0x328   : > { %v2074_v50 = vmax.f32 %v2042_v0, %v1956_v53  ;;  %v1769_v26 = vadd.f32 %v1768_v41, %v1480_v18  ;;  %2237 = vst [vmem:[%s3462_s16 + $0x88] sm:$0xff] %v2105_v52  ;;  %v1962_v19 = vadd.f32 %v1961_v1, %v1480_v18 }
 0x329   : > { %v1772_v28 = vpop.f32.mrf.mxu0  ;;  %v1965_v32 = vpop.f32.mrf.mxu1 }
 0x32a   : > { %v2106_v24 = vmax.f32 %v2074_v50, %v1958_v58  ;;  %v2043_v48 = vmax.f32 %v1767_v37, %v1769_v26  ;;  %v1773_v49 = vadd.f32 %v1772_v28, %v1485_v12  ;;  %v1966_v11 = vadd.f32 %v1965_v32, %v1485_v12  ;;  %v1510_v37 = vpop.permute.xlu0 %1509 }
 0x32b   : > { %v1774_v46 = vpop.f32.mrf.mxu0  ;;  %v1967_v33 = vpop.f32.mrf.mxu1 }
 0x32c   : > { %v2075_v34 = vmax.f32 %v2043_v48, %v1960_v15  ;;  %v1775_v60 = vadd.f32 %v1774_v46, %v1485_v12  ;;  %2238 = vst [vmem:[%s3462_s16 + $0x90] sm:$0xff] %v2106_v24  ;;  %v1968_v55 = vadd.f32 %v1967_v33, %v1485_v12 }
 0x32d   : > { %v1776_v51 = vpop.f32.mrf.mxu0  ;;  %v1969_v54 = vpop.f32.mrf.mxu1 }
 0x32e   : > { %v2107_v38 = vmax.f32 %v2075_v34, %v1962_v19  ;;  %v2044_v62 = vmax.f32 %v1773_v49, %v1775_v60  ;;  %v1777_v56 = vadd.f32 %v1776_v51, %v1490_v61  ;;  %v1970_v17 = vadd.f32 %v1969_v54, %v1490_v61  ;;  %v1515_v49 = vpop.permute.xlu1 %1514 }
 0x32f   : > { %v1778_v25 = vpop.f32.mrf.mxu0  ;;  %v1971_v47 = vpop.f32.mrf.mxu1 }
 0x330   : > { %v2076_v40 = vmax.f32 %v2044_v62, %v1966_v11  ;;  %v1779_v36 = vadd.f32 %v1778_v25, %v1490_v61  ;;  %2239 = vst [vmem:[%s3462_s16 + $0x98] sm:$0xff] %v2107_v38  ;;  %v1972_v7 = vadd.f32 %v1971_v47, %v1490_v61 }
 0x331   : > { %v1782_v45 = vpop.f32.mrf.mxu0  ;;  %v1975_v27 = vpop.f32.mrf.mxu1 }
 0x332   : > { %v2108_v6 = vmax.f32 %v2076_v40, %v1968_v55  ;;  %v2045_v14 = vmax.f32 %v1777_v56, %v1779_v36  ;;  %v1783_v5 = vadd.f32 %v1782_v45, %v1495_v4  ;;  %v1976_v20 = vadd.f32 %v1975_v27, %v1495_v4  ;;  %v1520_v56 = vpop.permute.xlu0 %1519 }
 0x333   : > { %v1784_v43 = vpop.f32.mrf.mxu0  ;;  %v1977_v16 = vpop.f32.mrf.mxu1 }
 0x334   : > { %v2077_v9 = vmax.f32 %v2045_v14, %v1970_v17  ;;  %v1785_v29 = vadd.f32 %v1784_v43, %v1495_v4  ;;  %2240 = vst [vmem:[%s3462_s16 + $0xa0] sm:$0xff] %v2108_v6  ;;  %v1978_v31 = vadd.f32 %v1977_v16, %v1495_v4 }
 0x335   : > { %v1786_v10 = vpop.f32.mrf.mxu0  ;;  %v1979_v39 = vpop.f32.mrf.mxu1 }
 0x336   : > { %v2109_v21 = vmax.f32 %v2077_v9, %v1972_v7  ;;  %v2046_v3 = vmax.f32 %v1783_v5, %v1785_v29  ;;  %v1787_v44 = vadd.f32 %v1786_v10, %v1500_v59  ;;  %v1980_v2 = vadd.f32 %v1979_v39, %v1500_v59  ;;  %v1525_v5 = vpop.permute.xlu1 %1524 }
 0x337   : > { %v1788_v57 = vpop.f32.mrf.mxu0  ;;  %v1981_v42 = vpop.f32.mrf.mxu1 }
 0x338   : > { %v2078_v30 = vmax.f32 %v2046_v3, %v1976_v20  ;;  %v1789_v63 = vadd.f32 %v1788_v57, %v1500_v59  ;;  %2241 = vst [vmem:[%s3462_s16 + $0xa8] sm:$0xff] %v2109_v21  ;;  %v1982_v18 = vadd.f32 %v1981_v42, %v1500_v59 }
 0x339   : > { %v1792_v13 = vpop.f32.mrf.mxu0  ;;  %v1985_v22 = vpop.f32.mrf.mxu1 }
 0x33a   : > { %v2110_v8 = vmax.f32 %v2078_v30, %v1978_v31  ;;  %v2047_v23 = vmax.f32 %v1787_v44, %v1789_v63  ;;  %v1793_v58 = vadd.f32 %v1792_v13, %v1505_v35  ;;  %v1986_v28 = vadd.f32 %v1985_v22, %v1505_v35  ;;  %v1530_v44 = vpop.permute.xlu0 %1529 }
 0x33b   : > { %v1794_v52 = vpop.f32.mrf.mxu0  ;;  %v1987_v53 = vpop.f32.mrf.mxu1 }
 0x33c   : > { %v2079_v0 = vmax.f32 %v2047_v23, %v1980_v2  ;;  %v1795_v41 = vadd.f32 %v1794_v52, %v1505_v35  ;;  %2242 = vst [vmem:[%s3462_s16 + $0xb0] sm:$0xff] %v2110_v8  ;;  %v1988_v12 = vadd.f32 %v1987_v53, %v1505_v35 }
 0x33d   : > { %v1796_v1 = vpop.f32.mrf.mxu0  ;;  %v1989_v50 = vpop.f32.mrf.mxu1 }
 0x33e   : > { %v2111_v26 = vmax.f32 %v2079_v0, %v1982_v18  ;;  %v2048_v32 = vmax.f32 %v1793_v58, %v1795_v41  ;;  %v1797_v19 = vadd.f32 %v1796_v1, %v1510_v37  ;;  %v1990_v51 = vadd.f32 %v1989_v50, %v1510_v37  ;;  %v1535_v58 = vpop.permute.xlu1 %1534 }
 0x33f   : > { %v1798_v24 = vpop.f32.mrf.mxu0  ;;  %v1991_v15 = vpop.f32.mrf.mxu1 }
 0x340   : > { %v2080_v48 = vmax.f32 %v2048_v32, %v1986_v28  ;;  %v1799_v46 = vadd.f32 %v1798_v24, %v1510_v37  ;;  %2243 = vst [vmem:[%s3462_s16 + $0xb8] sm:$0xff] %v2111_v26  ;;  %v1992_v61 = vadd.f32 %v1991_v15, %v1510_v37 }
 0x341   : > { %v1802_v33 = vpop.f32.mrf.mxu0  ;;  %v1995_v34 = vpop.f32.mrf.mxu1 }
 0x342   : > { %v2112_v60 = vmax.f32 %v2080_v48, %v1988_v12  ;;  %v2049_v54 = vmax.f32 %v1797_v19, %v1799_v46  ;;  %v1803_v55 = vadd.f32 %v1802_v33, %v1515_v49  ;;  %v1996_v45 = vadd.f32 %v1995_v34, %v1515_v49  ;;  %v1540_v34 = vpop.permute.xlu0 %1539 }
 0x343   : > { %v1804_v38 = vpop.f32.mrf.mxu0  ;;  %v1997_v11 = vpop.f32.mrf.mxu1 }
 0x344   : > { %v2081_v62 = vmax.f32 %v2049_v54, %v1990_v51  ;;  %v1805_v25 = vadd.f32 %v1804_v38, %v1515_v49  ;;  %2244 = vst [vmem:[%s3462_s16 + $0xc0] sm:$0xff] %v2112_v60  ;;  %v1998_v4 = vadd.f32 %v1997_v11, %v1515_v49 }
 0x345   : > { %v1806_v47 = vpop.f32.mrf.mxu0  ;;  %v1999_v40 = vpop.f32.mrf.mxu1 }
 0x346   : > { %v2113_v36 = vmax.f32 %v2081_v62, %v1992_v61  ;;  %v2050_v27 = vmax.f32 %v1803_v55, %v1805_v25  ;;  %v1807_v7 = vadd.f32 %v1806_v47, %v1520_v56  ;;  %v2000_v10 = vadd.f32 %v1999_v40, %v1520_v56 }
 0x347   : > { %v1808_v6 = vpop.f32.mrf.mxu0  ;;  %v2001_v17 = vpop.f32.mrf.mxu1 }
 0x348   : > { %v2082_v14 = vmax.f32 %v2050_v27, %v1996_v45  ;;  %v1809_v43 = vadd.f32 %v1808_v6, %v1520_v56  ;;  %2245 = vst [vmem:[%s3462_s16 + $0xc8] sm:$0xff] %v2113_v36  ;;  %v2002_v59 = vadd.f32 %v2001_v17, %v1520_v56 }
 0x349   : > { %v1812_v16 = vpop.f32.mrf.mxu0  ;;  %v2005_v9 = vpop.f32.mrf.mxu1 }
 0x34a   : > { %v2114_v29 = vmax.f32 %v2082_v14, %v1998_v4  ;;  %v2051_v39 = vmax.f32 %v1807_v7, %v1809_v43  ;;  %v1813_v31 = vadd.f32 %v1812_v16, %v1525_v5  ;;  %v2006_v13 = vadd.f32 %v2005_v9, %v1525_v5 }
 0x34b   : > { %v1814_v21 = vpop.f32.mrf.mxu0  ;;  %v2007_v20 = vpop.f32.mrf.mxu1 }
 0x34c   : > { %v2083_v3 = vmax.f32 %v2051_v39, %v2000_v10  ;;  %v1815_v57 = vadd.f32 %v1814_v21, %v1525_v5  ;;  %2246 = vst [vmem:[%s3462_s16 + $0xd0] sm:$0xff] %v2114_v29  ;;  %v2008_v35 = vadd.f32 %v2007_v20, %v1525_v5 }
 0x34d   : > { %v1816_v42 = vpop.f32.mrf.mxu0  ;;  %v2009_v30 = vpop.f32.mrf.mxu1 }
 0x34e   : > { %v2115_v63 = vmax.f32 %v2083_v3, %v2002_v59  ;;  %v2052_v22 = vmax.f32 %v1813_v31, %v1815_v57  ;;  %v1817_v18 = vadd.f32 %v1816_v42, %v1530_v44  ;;  %v2010_v1 = vadd.f32 %v2009_v30, %v1530_v44 }
 0x34f   : > { %v1818_v8 = vpop.f32.mrf.mxu0  ;;  %v2011_v2 = vpop.f32.mrf.mxu1 }
 0x350   : > { %v2084_v23 = vmax.f32 %v2052_v22, %v2006_v13  ;;  %v1819_v52 = vadd.f32 %v1818_v8, %v1530_v44  ;;  %2247 = vst [vmem:[%s3462_s16 + $0xd8] sm:$0xff] %v2115_v63  ;;  %v2012_v37 = vadd.f32 %v2011_v2, %v1530_v44 }
 0x351   : > { %v1822_v53 = vpop.f32.mrf.mxu0  ;;  %v2015_v0 = vpop.f32.mrf.mxu1 }
 0x352   : > { %v2116_v41 = vmax.f32 %v2084_v23, %v2008_v35  ;;  %v2053_v50 = vmax.f32 %v1817_v18, %v1819_v52  ;;  %v1823_v12 = vadd.f32 %v1822_v53, %v1535_v58  ;;  %v2016_v46 = vadd.f32 %v2015_v0, %v1535_v58 }
 0x353   : > { %v1824_v26 = vpop.f32.mrf.mxu0  ;;  %v2017_v28 = vpop.f32.mrf.mxu1 }
 0x354   : > { %v2085_v32 = vmax.f32 %v2053_v50, %v2010_v1  ;;  %v1825_v24 = vadd.f32 %v1824_v26, %v1535_v58  ;;  %2248 = vst [vmem:[%s3462_s16 + $0xe0] sm:$0xff] %v2116_v41  ;;  %v2018_v49 = vadd.f32 %v2017_v28, %v1535_v58 }
 0x355   : > { %v1826_v15 = vpop.f32.mrf.mxu0  ;;  %v2019_v48 = vpop.f32.mrf.mxu1 }
 0x356   : > { %v2117_v19 = vmax.f32 %v2085_v32, %v2012_v37  ;;  %v2054_v33 = vmax.f32 %v1823_v12, %v1825_v24  ;;  %v1827_v54 = vadd.f32 %v1826_v15, %v1540_v34  ;;  %v2020_v62 = vadd.f32 %v2019_v48, %v1540_v34 }
 0x357   : > { %v1828_v60 = vpop.f32.mrf.mxu0  ;;  %v2021_v38 = vpop.f32.mrf.mxu1 }
 0x358   : > { %v2086_v51 = vmax.f32 %v2054_v33, %v2016_v46  ;;  %v1829_v61 = vadd.f32 %v1828_v60, %v1540_v34  ;;  %2249 = vst [vmem:[%s3462_s16 + $0xe8] sm:$0xff] %v2117_v19  ;;  %v2022_v25 = vadd.f32 %v2021_v38, %v1540_v34 }
 0x35a   : > { %v2118_v11 = vmax.f32 %v2086_v51, %v2018_v49  ;;  %v2055_v55 = vmax.f32 %v1827_v54, %v1829_v61 }
 0x35c   : > { %v2087_v47 = vmax.f32 %v2055_v55, %v2020_v62  ;;  %2250 = vst [vmem:[%s3462_s16 + $0xf0] sm:$0xff] %v2118_v11 }
 0x35e   : > { %v2119_v40 = vmax.f32 %v2087_v47, %v2022_v25 }
 0x360   : > { %2251 = vst [vmem:[%s3462_s16 + $0xf8] sm:$0xff] %v2119_v40 }
 0x361   : > { %2515 = shalt.err (!%p2512_p5)
}
 0x362   : > { %s2516_s10 = scalar_lea.hbm %s3500_s21, 4096  ;;  %s2520_s16 = scalar_lea.hbm %s3559_s7, 16384 }
 0x363   : > { %p2517_p6 = scmp.ne.s32.totalorder %s3500_s21, %s2516_s10  ;;  %p2521_p10 = scmp.lt.s32.totalorder %s3500_s21, %s3559_s7 }
 0x364   : > { %p2522_p11 = scmp.lt.s32.totalorder %s2520_s16, %s2516_s10 }
 0x365   : > { %p2518_p7 = pnand %p2517_p6, %p2666_p4 }
 0x366   : > { %p2523_p12 = por %p2522_p11, %p2521_p10 }
 0x367   : > { %p2519_p9 = pneg %p2518_p7 }
 0x369   : > { %p2524_p13 = pnand %p2523_p12, %p2519_p9 }
 0x36b   : > { %2527 = shalt.err (!%p2524_p13)
}
 0x36c   : > { %s2584_s20 = smov 128   ;;  %s2585_s23 = smov 8  }
 0x36d   : > { %2397 = dma.vmem_to_hbm [thread:$0]  (%p2666_p4), %s3502_s18, 4096, %s3500_s21, %s3507_s22, %s2584_s20, %s2584_s20, %s2585_s23  }
 0x36e PF: > { %p2403_p0 = scmp.ge.s32.totalorder %s2578_s29, 2  ;;  %s2281_s27 = sand.u32 1, %s2558_s24  }
 0x36f   : > { %s2282_s30 = scalar_lea.sflag [#allocation3], %s2281_s27 }
 0x370   : > { %p2400_p1 = pnand %p2403_p0, %p2673_p8 }
 0x372   : > { %p2401_p2 = pneg %p2400_p1 }
 0x374   : > { %2553 = dma.done.wait (%p2401_p2), %s2282_s30, 4096  }
 0x375   : > { %2555 = vsyncadd (%p2401_p2), %s2282_s30, 4294963200  ;;  %s20_s29 = sadd.s32 1, %s2578_s29   ;;  %s3607_s24 = smov %s2562_s25 }
 0x376   : > { %p17_p3 = scmp.ge.s32.totalorder %s20_s29, 6   ;;  %s3608_s25 = smov %s2566_s26 }
 0x377   : > { %s3609_s26 = smov %s2679_s14  ;;  %s3610_s27 = smov %s2574_s28 }
 0x378   : > { %s3611_s28 = smov %s3613_s9  ;;  %19 = sbr.rel (!%p17_p3) target bundleno = 4 (0x4), region = 87 }
 0x37d   :  { %2287 = vsyncpa [#allocation3], 1 }
 0x37e   :  { %2289 = vsyncpa [#allocation3 + $0x1], 1 }

</bundles_post_ra>
